<compile_context>
chip_gen: v5e
topology: v5e:2x2
jax: 0.10.0
libtpu: 0.0.40
codegen_flags: <defaults>
</compile_context>

<pallas_src>
import functools
import numpy as np
import jax
import jax.numpy as jnp
from jax.experimental import pallas as pl
from jax.experimental.pallas import tpu as pltpu


def resblock_kernel(x_ref, mask_ref, g1_ref, b1_ref, w1_ref,
                    g2_ref, b2_ref, w2_ref, cb2_ref,
                    o_ref, ext_ref, slab_ref, *, H, W, G, conv_dtype):
    # x_ref    : (CP, TOT) f32        input, padded lane layout (zeros at pads/gaps)
    # mask_ref : (1, L)    f32        1.0 at real pixels, 0.0 at pad cols / gap rows
    # g*/b*    : (CP, 1)   f32        BN affine params
    # w*_ref   : (CP, 9*CP) conv_dtype fused-tap conv weights (Cout, 9*Cin)
    # cb2_ref  : (CP, 1)   f32        conv2 bias (conv1 bias is dead under BN2)
    # o_ref    : (CP, L)   f32        output window (residual already added)
    # ext_ref  : (CP, TOT) conv_dtype halo'd activation buffer
    # slab_ref : (9*CP, L) conv_dtype im2col slab (taps stacked on the K axis)
    CP, TOT = x_ref.shape
    L = o_ref.shape[1]
    WP = W + 1                       # row stride (one zero pad column per row)
    HP = H * WP                      # padded spatial size per image
    S = HP + G                       # image stride along the lane axis
    N = (TOT - G) // S
    eps = 1e-5
    inv_cnt = 1.0 / float(N * H * W)
    offs = [(kh - 1) * WP + (kw - 1) for kh in range(3) for kw in range(3)]

    mask = mask_ref[...]             # (1, L), hoisted; broadcasts over channels

    # Zero only the halo borders once; the interior is fully overwritten
    # (with masked activations) before each conv.
    ext_ref[:, 0:G] = jnp.zeros((CP, G), conv_dtype)
    ext_ref[:, G + L:TOT] = jnp.zeros((CP, G), conv_dtype)

    def bn_relu_conv(v, g_ref, b_ref, w_ref):
        # Training-mode BN (two-pass, biased variance) + ReLU + fused-tap conv.
        # v must be zero at pad/gap positions so the mean sum is exact.
        mean = jnp.sum(v, axis=1, keepdims=True) * inv_cnt            # (CP, 1)
        xc = (v - mean) * mask                                         # centered, masked
        var = jnp.sum(xc * xc, axis=1, keepdims=True) * inv_cnt        # (CP, 1)
        scale = g_ref[...] * jax.lax.rsqrt(var + eps)
        a = jnp.maximum(xc * scale + b_ref[...], 0.0)
        # BN+ReLU result goes straight into the halo buffer, already in the
        # MXU input dtype (single store per stage, no extra activation copy).
        ext_ref[:, G:G + L] = (a * mask).astype(conv_dtype)
        # im2col slab: 9 static lane-shifted windows stacked on the K axis.
        for t, d in enumerate(offs):
            slab_ref[t * CP:(t + 1) * CP, :] = ext_ref[:, G + d:G + d + L]
        # One MXU dot per conv: (Cout, 9*Cin) @ (9*Cin, N*spatial), f32 acc.
        return jnp.dot(w_ref[...], slab_ref[...],
                       preferred_element_type=jnp.float32,
                       precision=jax.lax.Precision.HIGHEST)            # (CP, L)

    xw = x_ref[:, G:G + L]                                   # (CP, L) f32
    # conv1 bias omitted on purpose: a per-channel constant before the
    # training-mode BN2 is cancelled exactly by BN2's mean subtraction.
    h1 = bn_relu_conv(xw, g1_ref, b1_ref, w1_ref)
    h1 = h1 * mask                                           # zero pads/gaps for BN2 stats
    h2 = bn_relu_conv(h1, g2_ref, b2_ref, w2_ref) + cb2_ref[...]
    o_ref[...] = xw + h2                                     # residual add


def resblock_forward(x_nchw, params, conv_dtype=jnp.bfloat16):
    """x_nchw: (N, C, H, W) float32; params as in the PyTorch module."""
    g1, b1, w1, cb1, g2, b2, w2, cb2 = params
    del cb1  # algebraically dead: cancelled by BN2's mean subtraction
    N, C, H, W = x_nchw.shape

    pack = 32 // jnp.dtype(conv_dtype).itemsize        # 8 sublanes (f32) / 16 (bf16)
    CP = ((C + pack - 1) // pack) * pack
    WP, HP = W + 1, H * (W + 1)
    G = WP + 1                                          # halo / inter-image gap
    S = HP + G                                          # per-image lane stride
    L = (N - 1) * S + HP                                # working window length
    TOT = L + 2 * G

    # ---- wrapper-side layout prep (plain XLA pads/transposes; tiny tensors).
    # TODO(synk): for production, fold this relayout into the producer op or a
    # tiled grid so it is not an extra HBM pass.
    xp = jnp.pad(x_nchw, ((0, 0), (0, CP - C), (0, 0), (0, 1)))   # pad col + chans
    xp = xp.reshape(N, CP, HP)
    xp = jnp.pad(xp, ((0, 0), (0, 0), (0, G)))                    # gap row per image
    x_ext = jnp.pad(jnp.transpose(xp, (1, 0, 2)).reshape(CP, N * S),
                    ((0, 0), (G, 0)))                             # (CP, TOT) f32

    pos = jnp.arange(L, dtype=jnp.int32)
    q = pos % S
    mask = ((q < HP) & ((q % WP) < W)).astype(jnp.float32).reshape(1, L)

    def bn_param(v, pad_val):
        return jnp.pad(v, (0, CP - C), constant_values=pad_val) \
                  .reshape(CP, 1).astype(jnp.float32)

    def tap_weights(w):
        # OIHW -> (Cout, 9*Cin) with K index = (kh*3 + kw)*CP + cin.
        wk = jnp.transpose(w, (2, 3, 0, 1))                           # (3,3,O,I)
        wk = jnp.pad(wk, ((0, 0), (0, 0), (0, CP - C), (0, CP - C)))  # (3,3,CP,CP)
        return jnp.transpose(wk, (2, 0, 1, 3)).reshape(CP, 9 * CP).astype(conv_dtype)

    kernel = functools.partial(resblock_kernel, H=H, W=W, G=G,
                               conv_dtype=conv_dtype)

    flops = 2 * (2 * CP * (9 * CP) * L)                 # two fused-tap convs
    bytes_accessed = 4 * CP * (TOT + L) + 2 * 2 * 9 * CP * CP + 4 * 6 * CP

    out = pl.pallas_call(
        kernel,
        out_shape=jax.ShapeDtypeStruct((CP, L), jnp.float32),
        in_specs=[pl.BlockSpec(memory_space=pltpu.MemorySpace.VMEM)] * 9,
        out_specs=pl.BlockSpec(memory_space=pltpu.MemorySpace.VMEM),
        scratch_shapes=[
            pltpu.VMEM((CP, TOT), conv_dtype),          # halo'd activation buffer
            pltpu.VMEM((9 * CP, L), conv_dtype),        # im2col slab (K = 9*Cin)
        ],
        cost_estimate=pl.CostEstimate(
            flops=flops, transcendentals=2 * CP, bytes_accessed=bytes_accessed),
    )(x_ext, mask,
      bn_param(g1, 1.0), bn_param(b1, 0.0), tap_weights(w1),
      bn_param(g2, 1.0), bn_param(b2, 0.0), tap_weights(w2), bn_param(cb2, 0.0))

    # ---- back to NCHW: drop padded channels, gap rows and pad columns.
    out = jnp.pad(out[:C], ((0, 0), (0, G)))            # (C, N*S)
    out = out.reshape(C, N, S)[:, :, :HP]
    out = out.reshape(C, N, H, WP)[:, :, :, :W]
    return jnp.transpose(out, (1, 0, 2, 3))             # (N, C, H, W)


def resblock_reference(x, params, conv_dtype=jnp.float32):
    """Pure-JAX reference (NCHW), mirrors the PyTorch forward in training mode."""
    g1, b1, w1, cb1, g2, b2, w2, cb2 = params

    def bn_relu(v, g, b):
        mean = v.mean(axis=(0, 2, 3), keepdims=True)
        var = ((v - mean) ** 2).mean(axis=(0, 2, 3), keepdims=True)
        y = (v - mean) * jax.lax.rsqrt(var + 1e-5) * g[None, :, None, None] \
            + b[None, :, None, None]
        return jnp.maximum(y, 0.0)

    def conv(v, w, cb):
        out = jax.lax.conv_general_dilated(
            v.astype(conv_dtype), w.astype(conv_dtype),
            window_strides=(1, 1), padding=((1, 1), (1, 1)),
            dimension_numbers=("NCHW", "OIHW", "NCHW"),
            preferred_element_type=jnp.float32,
            precision=jax.lax.Precision.HIGHEST)
        return out + cb[None, :, None, None]

    h = bn_relu(x, g1, b1)
    h = conv(h, w1, cb1)
    h = bn_relu(h, g2, b2)
    h = conv(h, w2, cb2)
    return x + h


if __name__ == "__main__":
    N, C, H, W = 2, 4, 16, 16
    key = jax.random.PRNGKey(0)
    ks = jax.random.split(key, 9)

    x = jax.random.normal(ks[0], (N, C, H, W), jnp.float32)
    g1 = 1.0 + 0.1 * jax.random.normal(ks[1], (C,), jnp.float32)
    b1 = 0.1 * jax.random.normal(ks[2], (C,), jnp.float32)
    w1 = 0.1 * jax.random.normal(ks[3], (C, C, 3, 3), jnp.float32)
    cb1 = 0.1 * jax.random.normal(ks[4], (C,), jnp.float32)
    g2 = 1.0 + 0.1 * jax.random.normal(ks[5], (C,), jnp.float32)
    b2 = 0.1 * jax.random.normal(ks[6], (C,), jnp.float32)
    w2 = 0.1 * jax.random.normal(ks[7], (C, C, 3, 3), jnp.float32)
    cb2 = 0.1 * jax.random.normal(ks[8], (C,), jnp.float32)
    params = (g1, b1, w1, cb1, g2, b2, w2, cb2)

    # Strict check: f32 MXU inputs vs. f32 reference.
    out_f32 = jax.block_until_ready(resblock_forward(x, params, conv_dtype=jnp.float32))
    ref_f32 = jax.block_until_ready(resblock_reference(x, params, conv_dtype=jnp.float32))
    assert out_f32.shape == x.shape and out_f32.dtype == x.dtype
    np.testing.assert_allclose(np.asarray(out_f32), np.asarray(ref_f32),
                               rtol=2e-3, atol=2e-3)

    # Default perf path: bf16 MXU inputs (f32 accumulation), compared against a
    # reference that quantizes the conv operands identically.
    out_bf16 = jax.block_until_ready(resblock_forward(x, params))
    ref_bf16 = jax.block_until_ready(resblock_reference(x, params, conv_dtype=jnp.bfloat16))
    assert out_bf16.shape == x.shape and out_bf16.dtype == x.dtype
    np.testing.assert_allclose(np.asarray(out_bf16), np.asarray(ref_bf16),
                               rtol=1e-2, atol=1e-2)

    print("KERNEL_OK")
</pallas_src>

<mosaic_0001>
module attributes {stable_mosaic.version = 11 : i64} {
  func.func @resblock_kernel(%arg0: memref<8x598xf32, #tpu.memory_space<vmem>>, %arg1: memref<1x562xf32, #tpu.memory_space<vmem>>, %arg2: memref<8x1xf32, #tpu.memory_space<vmem>>, %arg3: memref<8x1xf32, #tpu.memory_space<vmem>>, %arg4: memref<8x72xf32, #tpu.memory_space<vmem>>, %arg5: memref<8x1xf32, #tpu.memory_space<vmem>>, %arg6: memref<8x1xf32, #tpu.memory_space<vmem>>, %arg7: memref<8x72xf32, #tpu.memory_space<vmem>>, %arg8: memref<8x1xf32, #tpu.memory_space<vmem>>, %arg9: memref<8x562xf32, #tpu.memory_space<vmem>>, %arg10: memref<8x598xf32, #tpu.memory_space<vmem>>, %arg11: memref<72x562xf32, #tpu.memory_space<vmem>>) attributes {dimension_semantics = [], scalar_prefetch = 0 : i64, scratch_operands = 2 : i64, tpu.core_type = #tpu.core_type<tc>} {
    %c0 = arith.constant 0 : index
    %c0_0 = arith.constant 0 : index
    %0 = vector.load %arg1[%c0, %c0_0] : memref<1x562xf32, #tpu.memory_space<vmem>>, vector<1x562xf32>
    %cst = arith.constant 0.000000e+00 : f32
    %1 = vector.broadcast %cst : f32 to vector<8x18xf32>
    %c0_1 = arith.constant 0 : index
    %c0_2 = arith.constant 0 : index
    %2 = vector.load %arg10[%c0_1, %c0_2] : memref<8x598xf32, #tpu.memory_space<vmem>>, vector<8x18xf32>
    tpu.vector_store %arg10[%c0_1, %c0_2], %1 {strides = array<i32>} : memref<8x598xf32, #tpu.memory_space<vmem>>, vector<8x18xf32>,
    %cst_3 = arith.constant 0.000000e+00 : f32
    %3 = vector.broadcast %cst_3 : f32 to vector<8x18xf32>
    %c0_4 = arith.constant 0 : index
    %c580 = arith.constant 580 : index
    %4 = vector.load %arg10[%c0_4, %c580] : memref<8x598xf32, #tpu.memory_space<vmem>>, vector<8x18xf32>
    tpu.vector_store %arg10[%c0_4, %c580], %3 {strides = array<i32>} : memref<8x598xf32, #tpu.memory_space<vmem>>, vector<8x18xf32>,
    %c0_5 = arith.constant 0 : index
    %c18 = arith.constant 18 : index
    %5 = vector.load %arg0[%c0_5, %c18] : memref<8x598xf32, #tpu.memory_space<vmem>>, vector<8x562xf32>
    %cst_6 = arith.constant dense<0.000000e+00> : vector<8xf32>
    %6 = vector.multi_reduction <add>, %5, %cst_6 [1] : vector<8x562xf32> to vector<8xf32>
    %7 = vector.shape_cast %6 : vector<8xf32> to vector<8x1xf32>
    %cst_7 = arith.constant 0.001953125 : f32
    %8 = vector.broadcast %cst_7 : f32 to vector<8x1xf32>
    %9 = arith.mulf %7, %8 : vector<8x1xf32>
    %10 = vector.broadcast %9 : vector<8x1xf32> to vector<8x562xf32>
    %11 = arith.subf %5, %10 : vector<8x562xf32>
    %12 = vector.broadcast %0 : vector<1x562xf32> to vector<8x562xf32>
    %13 = arith.mulf %11, %12 : vector<8x562xf32>
    %14 = arith.mulf %13, %13 : vector<8x562xf32>
    %cst_8 = arith.constant dense<0.000000e+00> : vector<8xf32>
    %15 = vector.multi_reduction <add>, %14, %cst_8 [1] : vector<8x562xf32> to vector<8xf32>
    %16 = vector.shape_cast %15 : vector<8xf32> to vector<8x1xf32>
    %cst_9 = arith.constant 0.001953125 : f32
    %17 = vector.broadcast %cst_9 : f32 to vector<8x1xf32>
    %18 = arith.mulf %16, %17 : vector<8x1xf32>
    %c0_10 = arith.constant 0 : index
    %c0_11 = arith.constant 0 : index
    %19 = vector.load %arg2[%c0_10, %c0_11] : memref<8x1xf32, #tpu.memory_space<vmem>>, vector<8x1xf32>
    %cst_12 = arith.constant 9.99999974E-6 : f32
    %20 = vector.broadcast %cst_12 : f32 to vector<8x1xf32>
    %21 = arith.addf %18, %20 : vector<8x1xf32>
    %22 = math.rsqrt %21 : vector<8x1xf32>
    %23 = arith.mulf %19, %22 : vector<8x1xf32>
    %24 = vector.broadcast %23 : vector<8x1xf32> to vector<8x562xf32>
    %25 = arith.mulf %13, %24 : vector<8x562xf32>
    %c0_13 = arith.constant 0 : index
    %c0_14 = arith.constant 0 : index
    %26 = vector.load %arg3[%c0_13, %c0_14] : memref<8x1xf32, #tpu.memory_space<vmem>>, vector<8x1xf32>
    %27 = vector.broadcast %26 : vector<8x1xf32> to vector<8x562xf32>
    %28 = arith.addf %25, %27 : vector<8x562xf32>
    %cst_15 = arith.constant 0.000000e+00 : f32
    %29 = vector.broadcast %cst_15 : f32 to vector<8x562xf32>
    %30 = arith.maximumf %28, %29 : vector<8x562xf32>
    %31 = vector.broadcast %0 : vector<1x562xf32> to vector<8x562xf32>
    %32 = arith.mulf %30, %31 : vector<8x562xf32>
    %c0_16 = arith.constant 0 : index
    %c18_17 = arith.constant 18 : index
    %33 = vector.load %arg10[%c0_16, %c18_17] : memref<8x598xf32, #tpu.memory_space<vmem>>, vector<8x562xf32>
    tpu.vector_store %arg10[%c0_16, %c18_17], %32 {strides = array<i32>} : memref<8x598xf32, #tpu.memory_space<vmem>>, vector<8x562xf32>,
    %c0_18 = arith.constant 0 : index
    %c0_19 = arith.constant 0 : index
    %34 = vector.load %arg10[%c0_18, %c0_19] : memref<8x598xf32, #tpu.memory_space<vmem>>, vector<8x562xf32>
    %c0_20 = arith.constant 0 : index
    %c0_21 = arith.constant 0 : index
    %35 = vector.load %arg11[%c0_20, %c0_21] : memref<72x562xf32, #tpu.memory_space<vmem>>, vector<8x562xf32>
    tpu.vector_store %arg11[%c0_20, %c0_21], %34 {strides = array<i32>} : memref<72x562xf32, #tpu.memory_space<vmem>>, vector<8x562xf32>,
    %c0_22 = arith.constant 0 : index
    %c1 = arith.constant 1 : index
    %36 = vector.load %arg10[%c0_22, %c1] : memref<8x598xf32, #tpu.memory_space<vmem>>, vector<8x562xf32>
    %c8 = arith.constant 8 : index
    %c0_23 = arith.constant 0 : index
    %37 = vector.load %arg11[%c8, %c0_23] : memref<72x562xf32, #tpu.memory_space<vmem>>, vector<8x562xf32>
    tpu.vector_store %arg11[%c8, %c0_23], %36 {strides = array<i32>} : memref<72x562xf32, #tpu.memory_space<vmem>>, vector<8x562xf32>,
    %c0_24 = arith.constant 0 : index
    %c2 = arith.constant 2 : index
    %38 = vector.load %arg10[%c0_24, %c2] : memref<8x598xf32, #tpu.memory_space<vmem>>, vector<8x562xf32>
    %c16 = arith.constant 16 : index
    %c0_25 = arith.constant 0 : index
    %39 = vector.load %arg11[%c16, %c0_25] : memref<72x562xf32, #tpu.memory_space<vmem>>, vector<8x562xf32>
    tpu.vector_store %arg11[%c16, %c0_25], %38 {strides = array<i32>} : memref<72x562xf32, #tpu.memory_space<vmem>>, vector<8x562xf32>,
    %c0_26 = arith.constant 0 : index
    %c17 = arith.constant 17 : index
    %40 = vector.load %arg10[%c0_26, %c17] : memref<8x598xf32, #tpu.memory_space<vmem>>, vector<8x562xf32>
    %c24 = arith.constant 24 : index
    %c0_27 = arith.constant 0 : index
    %41 = vector.load %arg11[%c24, %c0_27] : memref<72x562xf32, #tpu.memory_space<vmem>>, vector<8x562xf32>
    tpu.vector_store %arg11[%c24, %c0_27], %40 {strides = array<i32>} : memref<72x562xf32, #tpu.memory_space<vmem>>, vector<8x562xf32>,
    %c0_28 = arith.constant 0 : index
    %c18_29 = arith.constant 18 : index
    %42 = vector.load %arg10[%c0_28, %c18_29] : memref<8x598xf32, #tpu.memory_space<vmem>>, vector<8x562xf32>
    %c32 = arith.constant 32 : index
    %c0_30 = arith.constant 0 : index
    %43 = vector.load %arg11[%c32, %c0_30] : memref<72x562xf32, #tpu.memory_space<vmem>>, vector<8x562xf32>
    tpu.vector_store %arg11[%c32, %c0_30], %42 {strides = array<i32>} : memref<72x562xf32, #tpu.memory_space<vmem>>, vector<8x562xf32>,
    %c0_31 = arith.constant 0 : index
    %c19 = arith.constant 19 : index
    %44 = vector.load %arg10[%c0_31, %c19] : memref<8x598xf32, #tpu.memory_space<vmem>>, vector<8x562xf32>
    %c40 = arith.constant 40 : index
    %c0_32 = arith.constant 0 : index
    %45 = vector.load %arg11[%c40, %c0_32] : memref<72x562xf32, #tpu.memory_space<vmem>>, vector<8x562xf32>
    tpu.vector_store %arg11[%c40, %c0_32], %44 {strides = array<i32>} : memref<72x562xf32, #tpu.memory_space<vmem>>, vector<8x562xf32>,
    %c0_33 = arith.constant 0 : index
    %c34 = arith.constant 34 : index
    %46 = vector.load %arg10[%c0_33, %c34] : memref<8x598xf32, #tpu.memory_space<vmem>>, vector<8x562xf32>
    %c48 = arith.constant 48 : index
    %c0_34 = arith.constant 0 : index
    %47 = vector.load %arg11[%c48, %c0_34] : memref<72x562xf32, #tpu.memory_space<vmem>>, vector<8x562xf32>
    tpu.vector_store %arg11[%c48, %c0_34], %46 {strides = array<i32>} : memref<72x562xf32, #tpu.memory_space<vmem>>, vector<8x562xf32>,
    %c0_35 = arith.constant 0 : index
    %c35 = arith.constant 35 : index
    %48 = vector.load %arg10[%c0_35, %c35] : memref<8x598xf32, #tpu.memory_space<vmem>>, vector<8x562xf32>
    %c56 = arith.constant 56 : index
    %c0_36 = arith.constant 0 : index
    %49 = vector.load %arg11[%c56, %c0_36] : memref<72x562xf32, #tpu.memory_space<vmem>>, vector<8x562xf32>
    tpu.vector_store %arg11[%c56, %c0_36], %48 {strides = array<i32>} : memref<72x562xf32, #tpu.memory_space<vmem>>, vector<8x562xf32>,
    %c0_37 = arith.constant 0 : index
    %c36 = arith.constant 36 : index
    %50 = vector.load %arg10[%c0_37, %c36] : memref<8x598xf32, #tpu.memory_space<vmem>>, vector<8x562xf32>
    %c64 = arith.constant 64 : index
    %c0_38 = arith.constant 0 : index
    %51 = vector.load %arg11[%c64, %c0_38] : memref<72x562xf32, #tpu.memory_space<vmem>>, vector<8x562xf32>
    tpu.vector_store %arg11[%c64, %c0_38], %50 {strides = array<i32>} : memref<72x562xf32, #tpu.memory_space<vmem>>, vector<8x562xf32>,
    %c0_39 = arith.constant 0 : index
    %c0_40 = arith.constant 0 : index
    %52 = vector.load %arg4[%c0_39, %c0_40] : memref<8x72xf32, #tpu.memory_space<vmem>>, vector<8x72xf32>
    %c0_41 = arith.constant 0 : index
    %c0_42 = arith.constant 0 : index
    %53 = vector.load %arg11[%c0_41, %c0_42] : memref<72x562xf32, #tpu.memory_space<vmem>>, vector<72x562xf32>
    %cst_43 = arith.constant dense<0.000000e+00> : vector<8x562xf32>
    %54 = tpu.matmul %52, %53, %cst_43 {dimension_numbers = #tpu.dot_dimension_numbers<[1], [0], [0], [1], [0, 0, 1, 1], [], []>, precision = #tpu.contract_precision<fp32>} : vector<8x72xf32>, vector<72x562xf32>, vector<8x562xf32> -> vector<8x562xf32>
    %55 = vector.broadcast %0 : vector<1x562xf32> to vector<8x562xf32>
    %56 = arith.mulf %54, %55 : vector<8x562xf32>
    %cst_44 = arith.constant dense<0.000000e+00> : vector<8xf32>
    %57 = vector.multi_reduction <add>, %56, %cst_44 [1] : vector<8x562xf32> to vector<8xf32>
    %58 = vector.shape_cast %57 : vector<8xf32> to vector<8x1xf32>
    %cst_45 = arith.constant 0.001953125 : f32
    %59 = vector.broadcast %cst_45 : f32 to vector<8x1xf32>
    %60 = arith.mulf %58, %59 : vector<8x1xf32>
    %61 = vector.broadcast %60 : vector<8x1xf32> to vector<8x562xf32>
    %62 = arith.subf %56, %61 : vector<8x562xf32>
    %63 = vector.broadcast %0 : vector<1x562xf32> to vector<8x562xf32>
    %64 = arith.mulf %62, %63 : vector<8x562xf32>
    %65 = arith.mulf %64, %64 : vector<8x562xf32>
    %cst_46 = arith.constant dense<0.000000e+00> : vector<8xf32>
    %66 = vector.multi_reduction <add>, %65, %cst_46 [1] : vector<8x562xf32> to vector<8xf32>
    %67 = vector.shape_cast %66 : vector<8xf32> to vector<8x1xf32>
    %cst_47 = arith.constant 0.001953125 : f32
    %68 = vector.broadcast %cst_47 : f32 to vector<8x1xf32>
    %69 = arith.mulf %67, %68 : vector<8x1xf32>
    %c0_48 = arith.constant 0 : index
    %c0_49 = arith.constant 0 : index
    %70 = vector.load %arg5[%c0_48, %c0_49] : memref<8x1xf32, #tpu.memory_space<vmem>>, vector<8x1xf32>
    %cst_50 = arith.constant 9.99999974E-6 : f32
    %71 = vector.broadcast %cst_50 : f32 to vector<8x1xf32>
    %72 = arith.addf %69, %71 : vector<8x1xf32>
    %73 = math.rsqrt %72 : vector<8x1xf32>
    %74 = arith.mulf %70, %73 : vector<8x1xf32>
    %75 = vector.broadcast %74 : vector<8x1xf32> to vector<8x562xf32>
    %76 = arith.mulf %64, %75 : vector<8x562xf32>
    %c0_51 = arith.constant 0 : index
    %c0_52 = arith.constant 0 : index
    %77 = vector.load %arg6[%c0_51, %c0_52] : memref<8x1xf32, #tpu.memory_space<vmem>>, vector<8x1xf32>
    %78 = vector.broadcast %77 : vector<8x1xf32> to vector<8x562xf32>
    %79 = arith.addf %76, %78 : vector<8x562xf32>
    %cst_53 = arith.constant 0.000000e+00 : f32
    %80 = vector.broadcast %cst_53 : f32 to vector<8x562xf32>
    %81 = arith.maximumf %79, %80 : vector<8x562xf32>
    %82 = vector.broadcast %0 : vector<1x562xf32> to vector<8x562xf32>
    %83 = arith.mulf %81, %82 : vector<8x562xf32>
    %c0_54 = arith.constant 0 : index
    %c18_55 = arith.constant 18 : index
    %84 = vector.load %arg10[%c0_54, %c18_55] : memref<8x598xf32, #tpu.memory_space<vmem>>, vector<8x562xf32>
    tpu.vector_store %arg10[%c0_54, %c18_55], %83 {strides = array<i32>} : memref<8x598xf32, #tpu.memory_space<vmem>>, vector<8x562xf32>,
    %c0_56 = arith.constant 0 : index
    %c0_57 = arith.constant 0 : index
    %85 = vector.load %arg10[%c0_56, %c0_57] : memref<8x598xf32, #tpu.memory_space<vmem>>, vector<8x562xf32>
    %c0_58 = arith.constant 0 : index
    %c0_59 = arith.constant 0 : index
    %86 = vector.load %arg11[%c0_58, %c0_59] : memref<72x562xf32, #tpu.memory_space<vmem>>, vector<8x562xf32>
    tpu.vector_store %arg11[%c0_58, %c0_59], %85 {strides = array<i32>} : memref<72x562xf32, #tpu.memory_space<vmem>>, vector<8x562xf32>,
    %c0_60 = arith.constant 0 : index
    %c1_61 = arith.constant 1 : index
    %87 = vector.load %arg10[%c0_60, %c1_61] : memref<8x598xf32, #tpu.memory_space<vmem>>, vector<8x562xf32>
    %c8_62 = arith.constant 8 : index
    %c0_63 = arith.constant 0 : index
    %88 = vector.load %arg11[%c8_62, %c0_63] : memref<72x562xf32, #tpu.memory_space<vmem>>, vector<8x562xf32>
    tpu.vector_store %arg11[%c8_62, %c0_63], %87 {strides = array<i32>} : memref<72x562xf32, #tpu.memory_space<vmem>>, vector<8x562xf32>,
    %c0_64 = arith.constant 0 : index
    %c2_65 = arith.constant 2 : index
    %89 = vector.load %arg10[%c0_64, %c2_65] : memref<8x598xf32, #tpu.memory_space<vmem>>, vector<8x562xf32>
    %c16_66 = arith.constant 16 : index
    %c0_67 = arith.constant 0 : index
    %90 = vector.load %arg11[%c16_66, %c0_67] : memref<72x562xf32, #tpu.memory_space<vmem>>, vector<8x562xf32>
    tpu.vector_store %arg11[%c16_66, %c0_67], %89 {strides = array<i32>} : memref<72x562xf32, #tpu.memory_space<vmem>>, vector<8x562xf32>,
    %c0_68 = arith.constant 0 : index
    %c17_69 = arith.constant 17 : index
    %91 = vector.load %arg10[%c0_68, %c17_69] : memref<8x598xf32, #tpu.memory_space<vmem>>, vector<8x562xf32>
    %c24_70 = arith.constant 24 : index
    %c0_71 = arith.constant 0 : index
    %92 = vector.load %arg11[%c24_70, %c0_71] : memref<72x562xf32, #tpu.memory_space<vmem>>, vector<8x562xf32>
    tpu.vector_store %arg11[%c24_70, %c0_71], %91 {strides = array<i32>} : memref<72x562xf32, #tpu.memory_space<vmem>>, vector<8x562xf32>,
    %c0_72 = arith.constant 0 : index
    %c18_73 = arith.constant 18 : index
    %93 = vector.load %arg10[%c0_72, %c18_73] : memref<8x598xf32, #tpu.memory_space<vmem>>, vector<8x562xf32>
    %c32_74 = arith.constant 32 : index
    %c0_75 = arith.constant 0 : index
    %94 = vector.load %arg11[%c32_74, %c0_75] : memref<72x562xf32, #tpu.memory_space<vmem>>, vector<8x562xf32>
    tpu.vector_store %arg11[%c32_74, %c0_75], %93 {strides = array<i32>} : memref<72x562xf32, #tpu.memory_space<vmem>>, vector<8x562xf32>,
    %c0_76 = arith.constant 0 : index
    %c19_77 = arith.constant 19 : index
    %95 = vector.load %arg10[%c0_76, %c19_77] : memref<8x598xf32, #tpu.memory_space<vmem>>, vector<8x562xf32>
    %c40_78 = arith.constant 40 : index
    %c0_79 = arith.constant 0 : index
    %96 = vector.load %arg11[%c40_78, %c0_79] : memref<72x562xf32, #tpu.memory_space<vmem>>, vector<8x562xf32>
    tpu.vector_store %arg11[%c40_78, %c0_79], %95 {strides = array<i32>} : memref<72x562xf32, #tpu.memory_space<vmem>>, vector<8x562xf32>,
    %c0_80 = arith.constant 0 : index
    %c34_81 = arith.constant 34 : index
    %97 = vector.load %arg10[%c0_80, %c34_81] : memref<8x598xf32, #tpu.memory_space<vmem>>, vector<8x562xf32>
    %c48_82 = arith.constant 48 : index
    %c0_83 = arith.constant 0 : index
    %98 = vector.load %arg11[%c48_82, %c0_83] : memref<72x562xf32, #tpu.memory_space<vmem>>, vector<8x562xf32>
    tpu.vector_store %arg11[%c48_82, %c0_83], %97 {strides = array<i32>} : memref<72x562xf32, #tpu.memory_space<vmem>>, vector<8x562xf32>,
    %c0_84 = arith.constant 0 : index
    %c35_85 = arith.constant 35 : index
    %99 = vector.load %arg10[%c0_84, %c35_85] : memref<8x598xf32, #tpu.memory_space<vmem>>, vector<8x562xf32>
    %c56_86 = arith.constant 56 : index
    %c0_87 = arith.constant 0 : index
    %100 = vector.load %arg11[%c56_86, %c0_87] : memref<72x562xf32, #tpu.memory_space<vmem>>, vector<8x562xf32>
    tpu.vector_store %arg11[%c56_86, %c0_87], %99 {strides = array<i32>} : memref<72x562xf32, #tpu.memory_space<vmem>>, vector<8x562xf32>,
    %c0_88 = arith.constant 0 : index
    %c36_89 = arith.constant 36 : index
    %101 = vector.load %arg10[%c0_88, %c36_89] : memref<8x598xf32, #tpu.memory_space<vmem>>, vector<8x562xf32>
    %c64_90 = arith.constant 64 : index
    %c0_91 = arith.constant 0 : index
    %102 = vector.load %arg11[%c64_90, %c0_91] : memref<72x562xf32, #tpu.memory_space<vmem>>, vector<8x562xf32>
    tpu.vector_store %arg11[%c64_90, %c0_91], %101 {strides = array<i32>} : memref<72x562xf32, #tpu.memory_space<vmem>>, vector<8x562xf32>,
    %c0_92 = arith.constant 0 : index
    %c0_93 = arith.constant 0 : index
    %103 = vector.load %arg7[%c0_92, %c0_93] : memref<8x72xf32, #tpu.memory_space<vmem>>, vector<8x72xf32>
    %c0_94 = arith.constant 0 : index
    %c0_95 = arith.constant 0 : index
    %104 = vector.load %arg11[%c0_94, %c0_95] : memref<72x562xf32, #tpu.memory_space<vmem>>, vector<72x562xf32>
    %cst_96 = arith.constant dense<0.000000e+00> : vector<8x562xf32>
    %105 = tpu.matmul %103, %104, %cst_96 {dimension_numbers = #tpu.dot_dimension_numbers<[1], [0], [0], [1], [0, 0, 1, 1], [], []>, precision = #tpu.contract_precision<fp32>} : vector<8x72xf32>, vector<72x562xf32>, vector<8x562xf32> -> vector<8x562xf32>
    %c0_97 = arith.constant 0 : index
    %c0_98 = arith.constant 0 : index
    %106 = vector.load %arg8[%c0_97, %c0_98] : memref<8x1xf32, #tpu.memory_space<vmem>>, vector<8x1xf32>
    %107 = vector.broadcast %106 : vector<8x1xf32> to vector<8x562xf32>
    %108 = arith.addf %105, %107 : vector<8x562xf32>
    %109 = arith.addf %5, %108 : vector<8x562xf32>
    %c0_99 = arith.constant 0 : index
    %c0_100 = arith.constant 0 : index
    %110 = vector.load %arg9[%c0_99, %c0_100] : memref<8x562xf32, #tpu.memory_space<vmem>>, vector<8x562xf32>
    tpu.vector_store %arg9[%c0_99, %c0_100], %109 {strides = array<i32>} : memref<8x562xf32, #tpu.memory_space<vmem>>, vector<8x562xf32>,
    return
  }
}

</mosaic_0001>

<bundles_post_ra>
// kernel: tpu_custom_call.1
= control target key start
LH: loop header
LB: loop body
LE: loop exit
PB: predicated region body
PF: predicated region fallthrough
CT: control target
= control target key end

     0   :  { %14 = vsyncpa [#allocation5], 0  ;;  %s5819_s0 = inlined_call_operand.vmem [shape: f32[8,598], index: 0, kind: input, shape index: {}]   ;;  %s5820_s1 = inlined_call_operand.hbm [shape: f32[1,562], index: 1, kind: input, shape index: {}]   ;;  %s5821_s2 = inlined_call_operand.vmem [shape: f32[8,1], index: 2, kind: input, shape index: {}]   ;;  %s5822_s3 = inlined_call_operand.vmem [shape: f32[8,1], index: 3, kind: input, shape index: {}]   ;;  %s5823_s4 = inlined_call_operand.vmem [shape: f32[8,72], index: 4, kind: input, shape index: {}]   ;;  %s5824_s5 = inlined_call_operand.vmem [shape: f32[8,1], index: 5, kind: input, shape index: {}]   ;;  %s5825_s6 = inlined_call_operand.vmem [shape: f32[8,1], index: 6, kind: input, shape index: {}]   ;;  %s5826_s7 = inlined_call_operand.hbm [shape: f32[8,72], index: 7, kind: input, shape index: {}]   ;;  %s5827_s8 = inlined_call_operand.vmem [shape: f32[8,1], index: 8, kind: input, shape index: {}]   ;;  %s5828_s9 = inlined_call_operand.hbm [shape: f32[8,562], index: 9, kind: output, shape index: {}]  }
   0x1   :  { %15 = vsyncpa [#allocation8], 0 }
   0x2   :  { %16 = vsyncpa [#allocation6], 0  ;;  %s24_s11 = sshll.u32 %s5820_s1, 4  ;;  %s3698_s12 = smov [#allocation4]   ;;  %s25_s11 = int_to_ptr.hbm [resolvable:$true] %s24_s11 }
   0x3   :  { %s26_s13 = sshll.u32 %s3698_s12, 4  ;;  %s45_s16 = sshll.u32 %s5826_s7, 4  ;;  %s27_s13 = int_to_ptr.vmem [resolvable:$true] %s26_s13  ;;  %s46_s16 = int_to_ptr.hbm [resolvable:$true] %s45_s16 }
   0x4   :  { %29 = dma.hbm_to_vmem [thread:$0]  %s25_s11, 80, %s27_s13, [#allocation5]  }
   0x5   :  { %s3699_s17 = smov [#allocation7]  }
   0x6   :  { %s47_s18 = sshll.u32 %s3699_s17, 4  ;;  %s48_s18 = int_to_ptr.vmem [resolvable:$true] %s47_s18 }
   0x7   :  { %50 = dma.hbm_to_vmem [thread:$0]  %s46_s16, 128, %s48_s18, [#allocation8]  }
   0x8   :  { %3692 = dma.done.wait [#allocation5], 80  }
   0x9   :  { %3693 = vsyncadd [#allocation5], 4294967216 }
   0xa   :  { %3694 = dma.done.wait [#allocation8], 128  }
   0xb   :  { %3695 = vsyncadd [#allocation8], 4294967168  ;;  %v68_v0 = vld [vmem:[%s5819_s0 + $0x10] sm:$0xff]  ;;  %v66_v1 = vld [vmem:[%s5819_s0] sm:$0xff]  ;;  %s3700_s22 = smov 110   ;;  %s3701_s28 = smov 18  }
   0xc   :  { %80 = vrot.lane.b32.xlu1 %v68_v0, %s3700_s22  ;;  %76 = vrot.lane.b32.xlu0 %v66_v1, %s3700_s22  ;;  %v3779_v2 = vld [vmem:[%s5819_s0 + $0x20] sm:$0xff]  ;;  %v69_v3 = vld [vmem:[%s5819_s0 + $0x18] sm:$0xff]  ;;  %v61_v5 = vld [vmem:[#allocation4] sm:$0x1f]  ;;  %vm86_vm0 = vcmask 900096   ;;  %vm99_vm1 = vcmask 408576  }
   0xd   :  { %84 = vrot.lane.b32.xlu2 %v3779_v2, %s3700_s22  ;;  %v67_v4 = vld [vmem:[%s5819_s0 + $0x8] sm:$0xff]  ;;  %v3791_v6 = vperm.slane %v61_v5, 0  ;;  %v3795_v7 = vperm.slane %v61_v5, 1  ;;  %v3797_v8 = vperm.slane %v61_v5, 2  ;;  %v3803_v9 = vperm.slane %v61_v5, 3  ;;  %s3706_s12 = smov 94  }
   0xe   :  { %v3805_v10 = vperm.slane %v61_v5, 4  ;;  %vm62_vm2 = vcmask 146432   ;;  %vm64_vm6 = vcmask 704032   ;;  %vm226_vm7 = vcmask 1047696   ;;  %s3707_s13 = smov 109   ;;  %s3708_s14 = smov 111  }
   0xf   :  { %vm231_vm8 = vcmask 556032   ;;  %s3709_s15 = smov 126   ;;  %s3710_s16 = smov 127   ;;  %vm507_vm9 = vcmask 752640   ;;  %vm472_vm10 = vcmask 760832   ;;  %vm437_vm11 = vcmask 769024  }
  0x10   :  { %vm402_vm12 = vcmask 891904   ;;  %vm333_vm13 = vcmask 908288   ;;  %vm568_vm14 = vcmask 588800   ;;  %vm298_vm15 = vcmask 1031168   ;;  %s3711_s30 = smov [#allocation9]  }
  0x11   :  { %s3581_s10 = sshll.u32 %s3711_s30, 4  ;;  %s3582_s10 = int_to_ptr.vmem [resolvable:$true] %s3581_s10 }
  0x14   :  { %82 = vrot.lane.b32.xlu1 %v69_v3, %s3700_s22  ;;  %78 = vrot.lane.b32.xlu0 %v67_v4, %s3700_s22 }
  0x1c   :  { %121 = vrot.lane.b32.xlu0 %v3791_v6, %s3701_s28  ;;  %123 = vrot.lane.b32.xlu1 %v3795_v7, %s3701_s28 }
  0x24   :  { %125 = vrot.lane.b32.xlu0 %v3797_v8, %s3701_s28  ;;  %127 = vrot.lane.b32.xlu1 %v3803_v9, %s3701_s28 }
  0x2c   :  { %129 = vrot.lane.b32.xlu0 %v3805_v10, %s3701_s28 }
  0x67   :  { %v85_v18 = vpop.permute.xlu2 %84 }
  0x68   :  { %v100_v23 = vsel %vm99_vm1, %v85_v18, 0.0 }
  0x7e   :  { %v81_v11 = vpop.permute.xlu1 %80  ;;  %v77_v12 = vpop.permute.xlu0 %76 }
  0x86   :  { %v83_v13 = vpop.permute.xlu1 %82  ;;  %v79_v14 = vpop.permute.xlu0 %78 }
  0x87   :  { %v87_v15 = vsel %vm86_vm0, %v77_v12, %v79_v14  ;;  %v88_v16 = vsel %vm86_vm0, %v79_v14, %v81_v11  ;;  %v89_v19 = vsel %vm86_vm0, %v81_v11, %v83_v13  ;;  %v90_v21 = vsel %vm86_vm0, %v83_v13, %v85_v18 }
  0x88   :  { %v96_v17 = vadd.f32 %v88_v16, %v87_v15  ;;  %v182_v16 = vld [vmem:[%s5821_s2] sm:$0xff]  ;;  %s3704_s2 = smov 92  }
  0x8a   :  { %v97_v20 = vadd.f32 %v96_v17, %v89_v19 }
  0x8c   :  { %v98_v22 = vadd.f32 %v97_v20, %v90_v21  ;;  %v3703_v20 = vmov 0.0  }
  0x8d   :  { %63 = vst.msk [vmem:[#allocation2] sm:$0xff] %vm62_vm2, %v3703_v20 }
  0x8e   :  { %v101_v24 = vadd.f32 %v100_v23, %v98_v22  ;;  %v3816_v25 = vpop.permute.xlu0 %121  ;;  %v124_v26 = vpop.permute.xlu1 %123  ;;  %65 = vst.msk [vmem:[#allocation2 + $0x20] sm:$0xff] %vm64_vm6, %v3703_v20 }
  0x8f   :  { %v3820_v29 = vsel %vm62_vm2, %v3816_v25, %v124_v26 }
  0x90   :  { %102 = vadd.xlane.f32.xlu2 %v101_v24 }
  0x96   :  { %v126_v30 = vpop.permute.xlu0 %125  ;;  %v128_v33 = vpop.permute.xlu1 %127 }
  0x97   :  { %v3833_v40 = vsel %vm62_vm2, %v124_v26, %v126_v30  ;;  %v3836_v41 = vsel %vm62_vm2, %v126_v30, %v128_v33 }
  0x9e   :  { %v130_v44 = vpop.permute.xlu0 %129 }
  0x9f   :  { %v3848_v48 = vsel %vm62_vm2, %v128_v33, %v130_v44 }
 0x103   :  { %v103_v27 = vpop.xlane.xlu2 %102 }
 0x104   :  { %v104_v28 = vmul.f32 0.001953125, %v103_v27 }
 0x106   :  { %v105_v31 = vsub.f32 %v66_v1, %v104_v28  ;;  %v106_v32 = vsub.f32 %v67_v4, %v104_v28  ;;  %v108_v36 = vsub.f32 %v69_v3, %v104_v28  ;;  %v107_v39 = vsub.f32 %v68_v0, %v104_v28 }
 0x107   :  { %v109_v45 = vsub.f32 %v3779_v2, %v104_v28  ;;  %v3702_v1 = vmov 0   ;;  %v205_v2 = vld [vmem:[%s5822_s3] sm:$0xff]  ;;  %s3705_s3 = smov 93  }
 0x108   :  { %v3823_v34 = vmul.f32 %v3816_v25, %v105_v31  ;;  %v3826_v35 = vmul.f32 %v3820_v29, %v106_v32  ;;  %v143_v42 = vmul.f32 %v3836_v41, %v108_v36  ;;  %v3842_v43 = vmul.f32 %v3833_v40, %v107_v39  ;;  %3609 = vset.pattern.permute.xlu0 %v3702_v1 }
 0x109   :  { %v144_v49 = vmul.f32 %v3848_v48, %v109_v45  ;;  %3608 = vset.pattern.permute.xlu1 %v3702_v1  ;;  %3610 = vset.pattern.permute.xlu2 %v3702_v1 }
 0x10a   :  { %v145_v37 = vmul.f32 %v3823_v34, %v3823_v34  ;;  %v146_v38 = vmul.f32 %v3826_v35, %v3826_v35  ;;  %v148_v46 = vmul.f32 %v143_v42, %v143_v42  ;;  %v147_v47 = vmul.f32 %v3842_v43, %v3842_v43 }
 0x10b   :  { %v149_v50 = vmul.f32 %v144_v49, %v144_v49 }
 0x10c   :  { %155 = vrot.lane.b32.xlu1 %v145_v37, %s3700_s22  ;;  %157 = vrot.lane.b32.xlu0 %v146_v38, %s3700_s22 }
 0x114   :  { %161 = vrot.lane.b32.xlu0 %v148_v46, %s3700_s22  ;;  %159 = vrot.lane.b32.xlu1 %v147_v47, %s3700_s22 }
 0x11c   :  { %163 = vrot.lane.b32.xlu1 %v149_v50, %s3700_s22 }
 0x124   :  { %208 = vperm.xlu1 %3608, %v205_v2  }
 0x17e   :  { %v156_v51 = vpop.permute.xlu1 %155  ;;  %v158_v52 = vpop.permute.xlu0 %157 }
 0x17f   :  { %v165_v55 = vsel %vm86_vm0, %v156_v51, %v158_v52 }
 0x186   :  { %v160_v53 = vpop.permute.xlu1 %159  ;;  %v162_v57 = vpop.permute.xlu0 %161 }
 0x187   :  { %v166_v54 = vsel %vm86_vm0, %v158_v52, %v160_v53  ;;  %v167_v58 = vsel %vm86_vm0, %v160_v53, %v162_v57 }
 0x188   :  { %v174_v56 = vadd.f32 %v166_v54, %v165_v55 }
 0x18a   :  { %v175_v59 = vadd.f32 %v174_v56, %v167_v58 }
 0x18e   :  { %v164_v60 = vpop.permute.xlu1 %163 }
 0x18f   :  { %v168_v61 = vsel %vm86_vm0, %v162_v57, %v164_v60  ;;  %v177_v63 = vsel %vm99_vm1, %v164_v60, 0.0 }
 0x190   :  { %v176_v62 = vadd.f32 %v175_v59, %v168_v61 }
 0x192   :  { %v178_v0 = vadd.f32 %v177_v63, %v176_v62 }
 0x194   :  { %179 = vadd.xlane.f32.xlu2 %v178_v0 }
 0x196   :  { %v209_v22 = vpop.permute.xlu1 %208 }
 0x207   :  { %v180_v3 = vpop.xlane.xlu2 %179 }
 0x208   :  { %v181_v4 = vmul.f32 0.001953125, %v180_v3 }
 0x20a   :  { %v183_v5 = vadd.f32 1e-05, %v181_v4 }
 0x20c   :  { %3611 = vrsqrt.f32 %v183_v5  ;;  %vm190_vm4 = vweird.f32 %v183_v5 }
 0x212   :  { %v3612_v11 = vpop.eup %3611 }
 0x213   :  { %v185_v12 = vmul.f32 %v3612_v11, %v183_v5  ;;  %vm191_vm3 = vweird.f32 %v3612_v11 }
 0x214   :  { %vm192_vm5 = vmor %vm190_vm4, %vm191_vm3  ;;  %vm263_vm3 = vcmask 1039360  }
 0x215   :  { %v186_v13 = vmul.f32 %v3612_v11, %v185_v12 }
 0x217   :  { %v187_v14 = vmul.f32 0.5, %v186_v13 }
 0x219   :  { %v188_v15 = vsub.f32 1.5, %v187_v14 }
 0x21b   :  { %v189_v17 = vmul.f32 %v3612_v11, %v188_v15 }
 0x21d   :  { %v193_v18 = vsel %vm192_vm5, %v3612_v11, %v189_v17 }
 0x21e   :  { %v194_v19 = vmul.f32 %v193_v18, %v182_v16 }
 0x220   :  { %197 = vperm.xlu0 %3609, %v194_v19  }
 0x292   :  { %v198_v21 = vpop.permute.xlu0 %197 }
 0x293   :  { %v200_v23 = vmul.f32 %v198_v21, %v3823_v34  ;;  %v201_v24 = vmul.f32 %v198_v21, %v3826_v35  ;;  %v203_v26 = vmul.f32 %v198_v21, %v143_v42  ;;  %v204_v27 = vmul.f32 %v198_v21, %v144_v49 }
 0x295   :  { %v211_v28 = vadd.f32 %v209_v22, %v200_v23  ;;  %v212_v30 = vadd.f32 %v209_v22, %v201_v24  ;;  %v214_v31 = vadd.f32 %v209_v22, %v203_v26  ;;  %v215_v32 = vadd.f32 %v209_v22, %v204_v27 }
 0x297   :  { %v216_v33 = vmax.f32 %v211_v28, 0.0  ;;  %v217_v36 = vmax.f32 %v212_v30, 0.0  ;;  %v219_v37 = vmax.f32 %v214_v31, 0.0  ;;  %v220_v38 = vmax.f32 %v215_v32, 0.0 }
 0x299   :  { %v221_v39 = vmul.f32 %v216_v33, %v3816_v25  ;;  %v3870_v44 = vmul.f32 %v217_v36, %v3820_v29  ;;  %v224_v34 = vmul.f32 %v219_v37, %v3836_v41  ;;  %v225_v35 = vmul.f32 %v220_v38, %v3848_v48  ;;  %v522_v33 = vld [vmem:[%s5823_s4] sm:$0xff] }
 0x29a   :  { %v202_v29 = vmul.f32 %v198_v21, %v3842_v43 }
 0x29b   :  { %227 = vst.msk [vmem:[#allocation2] sm:$0xff] %vm226_vm7, %v221_v39  ;;  %499 = vrot.lane.b32.xlu1 %v3870_v44, %s3704_s2 }
 0x29c   :  { %230 = vst [vmem:[#allocation2 + $0x18] sm:$0xff] %v224_v34  ;;  %v213_v41 = vadd.f32 %v209_v22, %v202_v29 }
 0x29d   :  { %232 = vst.msk [vmem:[#allocation2 + $0x20] sm:$0xff] %vm231_vm8, %v225_v35  ;;  %v570_v35 = vsel %vm568_vm14, %v522_v33, 0 }
 0x29e   :  { %v218_v45 = vmax.f32 %v213_v41, 0.0 }
 0x2a0   :  { %v3901_v46 = vmul.f32 %v218_v45, %v3833_v40  ;;  %v4057_v45 = vand.u32 4294901760, %v570_v35 }
 0x2a2   :  { %v3878_v42 = vld [vmem:[#allocation2] sm:$0xff] }
 0x2a3   :  { %497 = vrot.lane.b32.xlu2 %v3878_v42, %s3704_s2  ;;  %462 = vrot.lane.b32.xlu0 %v3878_v42, %s3705_s3 }
 0x2a4   :  { %464 = vrot.lane.b32.xlu1 %v3870_v44, %s3705_s3  ;;  %v237_v25 = vld [vmem:[#allocation2 + $0x20] sm:$0xff] }
 0x2a5   :  { %242 = vst.msk [vmem:[#allocation3 + $0x20] sm:$0xff] %vm99_vm1, %v237_v25  ;;  %v456_v40 = vld [vmem:[#allocation2 + $0x20] sm:$0xff] }
 0x2ab   :  { %427 = vrot.lane.b32.xlu0 %v3878_v42, %s3706_s12  ;;  %392 = vrot.lane.b32.xlu2 %v3878_v42, %s3707_s13 }
 0x2ac   :  { %429 = vrot.lane.b32.xlu1 %v3870_v44, %s3706_s12 }
 0x2b3   :  { %394 = vrot.lane.b32.xlu0 %v3870_v44, %s3707_s13  ;;  %360 = vrot.lane.b32.xlu2 %v3870_v44, %s3700_s22 }
 0x2b4   :  { %358 = vrot.lane.b32.xlu1 %v3878_v42, %s3700_s22 }
 0x2bb   :  { %501 = vrot.lane.b32.xlu0 %v3901_v46, %s3704_s2  ;;  %325 = vrot.lane.b32.xlu2 %v3870_v44, %s3708_s14 }
 0x2bc   :  { %323 = vrot.lane.b32.xlu1 %v3878_v42, %s3708_s14 }
 0x2c3   :  { %466 = vrot.lane.b32.xlu0 %v3901_v46, %s3705_s3  ;;  %290 = vrot.lane.b32.xlu2 %v3870_v44, %s3709_s15 }
 0x2c4   :  { %288 = vrot.lane.b32.xlu1 %v3878_v42, %s3709_s15 }
 0x2cb   :  { %431 = vrot.lane.b32.xlu0 %v3901_v46, %s3706_s12  ;;  %255 = vrot.lane.b32.xlu2 %v3870_v44, %s3710_s16 }
 0x2cc   :  { %253 = vrot.lane.b32.xlu1 %v3878_v42, %s3710_s16 }
 0x2d3   :  { %396 = vrot.lane.b32.xlu0 %v3901_v46, %s3707_s13  ;;  %327 = vrot.lane.b32.xlu2 %v3901_v46, %s3708_s14 }
 0x2d4   :  { %362 = vrot.lane.b32.xlu1 %v3901_v46, %s3700_s22 }
 0x2db   :  { %292 = vrot.lane.b32.xlu0 %v3901_v46, %s3709_s15  ;;  %503 = vrot.lane.b32.xlu2 %v224_v34, %s3704_s2 }
 0x2dc   :  { %257 = vrot.lane.b32.xlu1 %v3901_v46, %s3710_s16 }
 0x2e3   :  { %468 = vrot.lane.b32.xlu0 %v224_v34, %s3705_s3  ;;  %398 = vrot.lane.b32.xlu2 %v224_v34, %s3707_s13 }
 0x2e4   :  { %433 = vrot.lane.b32.xlu1 %v224_v34, %s3706_s12 }
 0x2eb   :  { %364 = vrot.lane.b32.xlu0 %v224_v34, %s3700_s22  ;;  %329 = vrot.lane.b32.xlu2 %v224_v34, %s3708_s14 }
 0x2ec   :  { %505 = vrot.lane.b32.xlu1 %v456_v40, %s3704_s2 }
 0x2f3   :  { %470 = vrot.lane.b32.xlu0 %v456_v40, %s3705_s3  ;;  %435 = vrot.lane.b32.xlu2 %v456_v40, %s3706_s12 }
 0x2f4   :  { %294 = vrot.lane.b32.xlu1 %v224_v34, %s3709_s15 }
 0x2fb   :  { %259 = vrot.lane.b32.xlu0 %v224_v34, %s3710_s16  ;;  %366 = vrot.lane.b32.xlu2 %v456_v40, %s3700_s22 }
 0x2fc   :  { %400 = vrot.lane.b32.xlu1 %v456_v40, %s3707_s13 }
 0x2fd   :  { %v498_v43 = vpop.permute.xlu2 %497 }
 0x303   :  { %331 = vrot.lane.b32.xlu0 %v456_v40, %s3708_s14  ;;  %261 = vrot.lane.b32.xlu2 %v456_v40, %s3710_s16 }
 0x304   :  { %296 = vrot.lane.b32.xlu1 %v456_v40, %s3709_s15 }
 0x305   :  { %v393_v47 = vpop.permute.xlu2 %392 }
 0x30d   :  { %v3947_v48 = vpop.permute.xlu2 %360  ;;  %v3949_v49 = vpop.permute.xlu1 %499 }
 0x30e   :  { %v508_v50 = vsel %vm507_vm9, %v498_v43, %v3949_v49 }
 0x30f   :  { %v3953_v51 = vand.u32 4294901760, %v508_v50 }
 0x311   :  { %580 = vmatpush.msra.mxu0 %v3953_v51  ;;  %720 = vmatpush.msra.mxu3 %v3953_v51  ;;  %v3958_v52 = vsub.f32 %v508_v50, %v3953_v51 }
 0x313   :  { %681 = vmatpush.msra.mxu2 %v3958_v52  ;;  %v615_v53 = vand.u32 4294901760, %v3958_v52 }
 0x315   :  { %v463_v54 = vpop.permute.xlu0 %462  ;;  %v3962_v55 = vpop.permute.xlu2 %325  ;;  %v616_v56 = vsub.f32 %v3958_v52, %v615_v53 }
 0x316   :  { %v3967_v57 = vpop.permute.xlu1 %464 }
 0x317   :  { %v473_v58 = vsel %vm472_vm10, %v463_v54, %v3967_v57  ;;  %v617_v59 = vand.u32 4294901760, %v616_v56 }
 0x318   :  { %v3971_v60 = vand.u32 4294901760, %v473_v58 }
 0x319   :  { %618 = vmatpush.msra.mxu1 %v617_v59 }
 0x31a   :  { %582 = vmatpush.msra.mxu0 %v3971_v60  ;;  %722 = vmatpush.msra.mxu3 %v3971_v60  ;;  %v3976_v61 = vsub.f32 %v473_v58, %v3971_v60 }
 0x31c   :  { %684 = vmatpush.msra.mxu2 %v3976_v61  ;;  %v621_v62 = vand.u32 4294901760, %v3976_v61 }
 0x31d   :  { %v428_v63 = vpop.permute.xlu0 %427  ;;  %v3980_v0 = vpop.permute.xlu2 %290 }
 0x31e   :  { %v3982_v1 = vpop.permute.xlu1 %429  ;;  %v622_v2 = vsub.f32 %v3976_v61, %v621_v62 }
 0x31f   :  { %v438_v3 = vsel %vm437_vm11, %v428_v63, %v3982_v1 }
 0x320   :  { %v3989_v4 = vand.u32 4294901760, %v438_v3  ;;  %v623_v5 = vand.u32 4294901760, %v622_v2  ;;  %v4079_v2 = vsub.f32 %v570_v35, %v4057_v45 }
 0x322   :  { %584 = vmatpush.msra.mxu0 %v3989_v4  ;;  %624 = vmatpush.msra.mxu1 %v623_v5  ;;  %v3993_v11 = vsub.f32 %v438_v3, %v3989_v4  ;;  %v4086_v3 = vand.u32 4294901760, %v3878_v42 }
 0x323   :  { %724 = vmatpush.msra.mxu3 %v3989_v4 }
 0x324   :  { %687 = vmatpush.msra.mxu2 %v3993_v11  ;;  %v627_v12 = vand.u32 4294901760, %v3993_v11  ;;  %v4110_v33 = vsub.f32 %v3878_v42, %v4086_v3 }
 0x325   :  { %v3998_v13 = vpop.permute.xlu0 %394  ;;  %v4000_v14 = vpop.permute.xlu2 %255 }
 0x326   :  { %v403_v15 = vsel %vm402_vm12, %v393_v47, %v3998_v13  ;;  %v359_v16 = vpop.permute.xlu1 %358  ;;  %v628_v17 = vsub.f32 %v3993_v11, %v627_v12 }
 0x327   :  { %v368_v18 = vsel %vm86_vm0, %v359_v16, %v3947_v48  ;;  %v4009_v19 = vand.u32 4294901760, %v403_v15 }
 0x328   :  { %v4011_v20 = vand.u32 4294901760, %v368_v18  ;;  %v629_v21 = vand.u32 4294901760, %v628_v17  ;;  %v4096_v17 = vand.u32 4294901760, %v4079_v2 }
 0x329   :  { %586 = vmatpush.msra.mxu0 %v4009_v19  ;;  %726 = vmatpush.msra.mxu3 %v4009_v19  ;;  %v4016_v22 = vsub.f32 %v403_v15, %v4009_v19 }
 0x32a   :  { %630 = vmatpush.msra.mxu1 %v629_v21  ;;  %v4019_v23 = vsub.f32 %v368_v18, %v4011_v20  ;;  %v600_v42 = vsub.f32 %v4079_v2, %v4096_v17 }
 0x32b   :  { %690 = vmatpush.msra.mxu2 %v4016_v22  ;;  %588 = vmatpush.msra.mxu0 %v4011_v20  ;;  %v633_v24 = vand.u32 4294901760, %v4016_v22 }
 0x32c   :  { %728 = vmatpush.msra.mxu3 %v4011_v20  ;;  %v639_v26 = vand.u32 4294901760, %v4019_v23 }
 0x32d   :  { %v4026_v27 = vpop.permute.xlu0 %501  ;;  %v4028_v28 = vpop.permute.xlu2 %327  ;;  %v634_v30 = vsub.f32 %v4016_v22, %v633_v24  ;;  %693 = vmatpush.msra.mxu2 %v4019_v23 }
 0x32e   :  { %v324_v31 = vpop.permute.xlu1 %323  ;;  %v640_v32 = vsub.f32 %v4019_v23, %v639_v26  ;;  %v509_v39 = vsel %vm507_vm9, %v3949_v49, %v4026_v27 }
 0x32f   :  { %v334_v36 = vsel %vm333_vm13, %v324_v31, %v3962_v55  ;;  %v635_v37 = vand.u32 4294901760, %v634_v30  ;;  %v4055_v41 = vand.u32 4294901760, %v509_v39 }
 0x330   :  { %v4042_v38 = vand.u32 4294901760, %v334_v36  ;;  %v641_v34 = vand.u32 4294901760, %v640_v32 }
 0x331   :  { %636 = vmatpush.msra.mxu1 %v635_v37  ;;  %v4076_v63 = vsub.f32 %v509_v39, %v4055_v41  ;;  %v335_v37 = vsel %vm333_vm13, %v3962_v55, %v4028_v28 }
 0x332   :  { %590 = vmatpush.msra.mxu0 %v4042_v38  ;;  %730 = vmatpush.msra.mxu3 %v4042_v38  ;;  %v4051_v25 = vsub.f32 %v334_v36, %v4042_v38 }
 0x333   :  { %642 = vmatpush.msra.mxu1 %v641_v34  ;;  %v5830_v16 = vand.u32 4294901760, %v4076_v63 }
 0x334   :  { %696 = vmatpush.msra.mxu2 %v4051_v25  ;;  %v5832_v29 = vand.u32 4294901760, %v4051_v25 }
 0x335   :  { %v4059_v40 = vpop.permute.xlu0 %466  ;;  %v4061_v43 = vpop.permute.xlu2 %503 }
 0x336   :  { %v474_v47 = vsel %vm472_vm10, %v3967_v57, %v4059_v40  ;;  %v289_v49 = vpop.permute.xlu1 %288  ;;  %v646_v50 = vsub.f32 %v4051_v25, %v5832_v29 }
 0x337   :  { %v299_v54 = vsel %vm298_vm15, %v289_v49, %v3980_v0  ;;  %v4071_v56 = vand.u32 4294901760, %v474_v47 }
 0x338   :  { %v4073_v58 = vand.u32 4294901760, %v299_v54  ;;  %v647_v59 = vand.u32 4294901760, %v646_v50 }
 0x339   :  { %v4089_v5 = vsub.f32 %v474_v47, %v4071_v56  ;;  %v866_v47 = vsub.f32 %v4076_v63, %v5830_v16 }
 0x33a   :  { %592 = vmatpush.msra.mxu0 %v4073_v58  ;;  %648 = vmatpush.msra.mxu1 %v647_v59  ;;  %v4083_v57 = vsub.f32 %v299_v54, %v4073_v58  ;;  %v663_v54 = vand.u32 4294901760, %v4110_v33  ;;  %v4138_v59 = vand.u32 4294901760, %v335_v37 }
 0x33b   :  { %732 = vmatpush.msra.mxu3 %v4073_v58  ;;  %v5829_v36 = vand.u32 4294901760, %v4089_v5 }
 0x33c   :  { %699 = vmatpush.msra.mxu2 %v4083_v57  ;;  %v5831_v15 = vand.u32 4294901760, %v4083_v57  ;;  %v664_v29 = vsub.f32 %v4110_v33, %v663_v54  ;;  %v4167_v52 = vsub.f32 %v335_v37, %v4138_v59 }
 0x33d   :  { %v4098_v18 = vpop.permute.xlu0 %431  ;;  %v4100_v21 = vpop.permute.xlu2 %398  ;;  %v872_v50 = vsub.f32 %v4089_v5, %v5829_v36 }
 0x33e   :  { %v439_v30 = vsel %vm437_vm11, %v3982_v1, %v4098_v18  ;;  %v254_v31 = vpop.permute.xlu1 %253  ;;  %v652_v32 = vsub.f32 %v4083_v57, %v5831_v15  ;;  %v895_v37 = vand.u32 4294901760, %v4167_v52 }
 0x33f   :  { %v264_v39 = vsel %vm263_vm3, %v254_v31, %v4000_v14  ;;  %v4118_v34 = vand.u32 4294901760, %v439_v30 }
 0x340   :  { %v4120_v1 = vand.u32 4294901760, %v264_v39  ;;  %v653_v35 = vand.u32 4294901760, %v652_v32 }
 0x341   :  { %v4128_v49 = vsub.f32 %v439_v30, %v4118_v34  ;;  %v867_v30 = vand.u32 4294901760, %v866_v47 }
 0x342   :  { %594 = vmatpush.msra.mxu0 %v4120_v1  ;;  %654 = vmatpush.msra.mxu1 %v653_v35  ;;  %v4132_v55 = vsub.f32 %v264_v39, %v4120_v1  ;;  %v4145_v39 = vand.u32 4294901760, %v600_v42  ;;  %v873_v42 = vand.u32 4294901760, %v872_v50 }
 0x343   :  { %734 = vmatpush.msra.mxu3 %v4120_v1  ;;  %v5833_v31 = vand.u32 4294901760, %v4128_v49 }
 0x344   :  { %596 = vmatpush.msra.mxu0 %v4086_v3  ;;  %702 = vmatpush.msra.mxu2 %v4132_v55  ;;  %v657_v32 = vand.u32 4294901760, %v4132_v55 }
 0x345   :  { %v4147_v35 = vpop.permute.xlu0 %396  ;;  %v4149_v36 = vpop.permute.xlu2 %329  ;;  %736 = vmatpush.msra.mxu3 %v4086_v3  ;;  %v878_v16 = vsub.f32 %v4128_v49, %v5833_v31  ;;  %602 = vmatmul.f32.vlgmr.msra.gmra.mxu0 %v4145_v39 }
 0x346   :  { %754 = vmatpush.msrb.mxu0 %v615_v53  ;;  %v404_v47 = vsel %vm402_vm12, %v3998_v13, %v4147_v35  ;;  %v4160_v15 = vpop.permute.xlu1 %362  ;;  %705 = vmatpush.msra.mxu2 %v4110_v33  ;;  %v658_v50 = vsub.f32 %v4132_v55, %v657_v32 }
 0x347   :  { %868 = vmatpush.msrb.mxu3 %v867_v30  ;;  %v369_v53 = vsel %vm86_vm0, %v3947_v48, %v4160_v15  ;;  %v879_v13 = vand.u32 4294901760, %v878_v16  ;;  %v4178_v30 = vand.u32 4294901760, %v404_v47  ;;  %v4193_v16 = vand.u32 4294901760, %v3870_v44  ;;  %708 = vmatmul.f32.vlgmr.msra.gmra.mxu2 %v4079_v2 }
 0x348   :  { %758 = vmatpush.msrb.mxu0 %v621_v62  ;;  %830 = vmatpush.msrb.mxu2 %v4055_v41  ;;  %v4180_v31 = vand.u32 4294901760, %v369_v53  ;;  %v659_v48 = vand.u32 4294901760, %v658_v50  ;;  %v5834_v50 = vand.u32 4294901760, %v4051_v25 }
 0x349   :  { %874 = vmatpush.msrb.mxu3 %v873_v42  ;;  %v4187_v61 = vsub.f32 %v404_v47, %v4178_v30  ;;  %v4226_v23 = vsub.f32 %v3870_v44, %v4193_v16 }
 0x34a   :  { %762 = vmatpush.msrb.mxu0 %v627_v12  ;;  %832 = vmatpush.msrb.mxu2 %v4071_v56  ;;  %v4190_v62 = vsub.f32 %v369_v53, %v4180_v31  ;;  %v665_v12 = vand.u32 4294901760, %v664_v29 }
 0x34b   :  { %880 = vmatpush.msrb.mxu3 %v879_v13  ;;  %660 = vmatpush.msra.mxu1 %v659_v48  ;;  %v883_v11 = vand.u32 4294901760, %v4187_v61 }
 0x34c   :  { %766 = vmatpush.msrb.mxu0 %v633_v24  ;;  %834 = vmatpush.msrb.mxu2 %v4118_v34  ;;  %v889_v47 = vand.u32 4294901760, %v4190_v62 }
 0x34d   :  { %740 = vmatmul.f32.vlgmr.msra.gmra.mxu3 %v4096_v17  ;;  %v4203_v42 = vpop.permute.xlu0 %292  ;;  %v4205_v53 = vpop.permute.xlu2 %435  ;;  %v884_v22 = vsub.f32 %v4187_v61, %v883_v11  ;;  %666 = vmatpush.msra.mxu1 %v665_v12 }
 0x34e   :  { %770 = vmatpush.msrb.mxu0 %v639_v26  ;;  %v300_v24 = vsel %vm298_vm15, %v3980_v0, %v4203_v42  ;;  %451 = vst.msk [vmem:[#allocation3 + $0x110] sm:$0xff] %vm99_vm1, %v4205_v53  ;;  %v4217_v29 = vpop.permute.xlu1 %257  ;;  %836 = vmatpush.msrb.mxu2 %v4178_v30  ;;  %v890_v13 = vsub.f32 %v4190_v62, %v889_v47 }
 0x34f   :  { %800 = vmatpush.msrb.mxu1 %v3953_v51  ;;  %v265_v0 = vsel %vm263_vm3, %v4000_v14, %v4217_v29  ;;  %v885_v26 = vand.u32 4294901760, %v884_v22  ;;  %v4233_v48 = vand.u32 4294901760, %v300_v24  ;;  %v896_v51 = vsub.f32 %v4167_v52, %v895_v37 }
 0x350   :  { %774 = vmatpush.msrb.mxu0 %v5834_v50  ;;  %668 = vmatmul.f32.vlgmr.msra.gmra.mxu1 %v4057_v45  ;;  %v4241_v44 = vand.u32 4294901760, %v265_v0  ;;  %v5835_v14 = vand.u32 4294901760, %v4083_v57  ;;  %v891_v25 = vand.u32 4294901760, %v890_v13  ;;  %v913_v57 = vand.u32 4294901760, %v4226_v23 }
 0x351   :  { %802 = vmatpush.msrb.mxu1 %v3971_v60  ;;  %838 = vmatpush.msrb.mxu2 %v4180_v31  ;;  %v4246_v12 = vsub.f32 %v300_v24, %v4233_v48  ;;  %v897_v60 = vand.u32 4294901760, %v896_v51  ;;  %v5837_v51 = vand.u32 4294901760, %v4089_v5 }
 0x352   :  { %886 = vmatpush.msrb.mxu3 %v885_v26  ;;  %778 = vmatpush.msrb.mxu0 %v5835_v14  ;;  %v4251_v22 = vsub.f32 %v265_v0, %v4241_v44  ;;  %v914_v33 = vsub.f32 %v4226_v23, %v913_v57 }
 0x353   :  { %804 = vmatpush.msrb.mxu1 %v3989_v4  ;;  %840 = vmatpush.msrb.mxu2 %v4138_v59  ;;  %v901_v26 = vand.u32 4294901760, %v4246_v12 }
 0x354   :  { %892 = vmatpush.msrb.mxu3 %v891_v25  ;;  %782 = vmatpush.msrb.mxu0 %v657_v32  ;;  %v907_v4 = vand.u32 4294901760, %v4251_v22  ;;  %v915_v50 = vand.u32 4294901760, %v914_v33 }
 0x355   :  { %806 = vmatpush.msrb.mxu1 %v4009_v19  ;;  %842 = vmatpush.msrb.mxu2 %v4233_v48  ;;  %v4260_v24 = vpop.permute.xlu0 %468  ;;  %v4262_v13 = vpop.permute.xlu2 %366  ;;  %v902_v55 = vsub.f32 %v4246_v12, %v901_v26 }
 0x356   :  { %898 = vmatpush.msrb.mxu3 %v897_v60  ;;  %786 = vmatpush.msrb.mxu0 %v663_v54  ;;  %381 = vst.msk [vmem:[#allocation3 + $0xc0] sm:$0xff] %vm99_vm1, %v4262_v13  ;;  %v4271_v19 = vpop.permute.xlu1 %433  ;;  %v908_v32 = vsub.f32 %v4251_v22, %v907_v4  ;;  %v5836_v54 = vand.u32 4294901760, %v4076_v63 }
 0x357   :  { %808 = vmatpush.msrb.mxu1 %v4011_v20  ;;  %844 = vmatpush.msrb.mxu2 %v4241_v44  ;;  %v903_v0 = vand.u32 4294901760, %v902_v55 }
 0x358   :  { %931 = vmatpush.msra.mxu0 %v4076_v63  ;;  %v909_v20 = vand.u32 4294901760, %v908_v32  ;;  %v5838_v63 = vand.u32 4294901760, %v4128_v49 }
 0x359   :  { %810 = vmatpush.msrb.mxu1 %v4042_v38  ;;  %846 = vmatpush.msrb.mxu2 %v4193_v16 }
 0x35a   :  { %904 = vmatpush.msrb.mxu3 %v903_v0  ;;  %934 = vmatpush.msra.mxu0 %v4089_v5  ;;  %v510_v5 = vsel %vm507_vm9, %v4026_v27, %v4061_v43 }
 0x35b   :  { %1004 = vmatpush.msra.mxu2 %v5836_v54  ;;  %812 = vmatpush.msrb.mxu1 %v4073_v58  ;;  %v4324_v27 = vand.u32 4294901760, %v510_v5  ;;  %v441_v54 = vsel %vm437_vm11, %v4271_v19, %v4205_v53 }
 0x35c   :  { %910 = vmatpush.msrb.mxu3 %v909_v20  ;;  %937 = vmatpush.msra.mxu0 %v4128_v49 }
 0x35d   :  { %1008 = vmatpush.msra.mxu2 %v5837_v51  ;;  %814 = vmatpush.msrb.mxu1 %v4120_v1  ;;  %v4292_v38 = vpop.permute.xlu0 %364  ;;  %v4294_v14 = vpop.permute.xlu2 %261 }
 0x35e   :  { %916 = vmatpush.msrb.mxu3 %v915_v50  ;;  %940 = vmatpush.msra.mxu0 %v4187_v61  ;;  %277 = vst.msk [vmem:[#allocation3 + $0x48] sm:$0xff] %vm99_vm1, %v4294_v14  ;;  %v4299_v58 = vpop.permute.xlu1 %505  ;;  %v336_v61 = vsel %vm333_vm13, %v4028_v28, %v4149_v36 }
 0x35f   :  { %1012 = vmatpush.msra.mxu2 %v5838_v63  ;;  %816 = vmatpush.msrb.mxu1 %v4086_v3  ;;  %521 = vst.msk [vmem:[#allocation3 + $0x160] sm:$0xff] %vm99_vm1, %v4299_v58  ;;  %v475_v3 = vsel %vm472_vm10, %v4059_v40, %v4260_v24  ;;  %v405_v40 = vsel %vm402_vm12, %v4147_v35, %v4100_v21 }
 0x360   :  { %1050 = vmatpush.msra.mxu3 %v4055_v41  ;;  %943 = vmatpush.msra.mxu0 %v4190_v62  ;;  %v370_v35 = vsel %vm86_vm0, %v4160_v15, %v4292_v38  ;;  %v511_v60 = vsel %vm507_vm9, %v4061_v43, %v4299_v58  ;;  %v4435_v43 = vand.u32 4294901760, %v3901_v46 }
 0x361   :  { %970 = vmatpush.msra.mxu1 %v4055_v41  ;;  %1016 = vmatpush.msra.mxu2 %v883_v11  ;;  %v440_v41 = vsel %vm437_vm11, %v4098_v18, %v4271_v19  ;;  %v4345_v18 = vand.u32 4294901760, %v475_v3  ;;  %v4382_v62 = vand.u32 4294901760, %v370_v35  ;;  %v4453_v20 = vand.u32 4294901760, %v511_v60 }
 0x362   :  { %1052 = vmatpush.msra.mxu3 %v4071_v56  ;;  %946 = vmatpush.msra.mxu0 %v4167_v52  ;;  %v4355_v49 = vand.u32 4294901760, %v440_v41  ;;  %v4362_v52 = vand.u32 4294901760, %v405_v40  ;;  %v4470_v53 = vsub.f32 %v3901_v46, %v4435_v43 }
 0x363   :  { %972 = vmatpush.msra.mxu1 %v4071_v56  ;;  %1020 = vmatpush.msra.mxu2 %v889_v47  ;;  %v4396_v47 = vand.u32 4294901760, %v336_v61  ;;  %v4484_v46 = vsub.f32 %v511_v60, %v4453_v20 }
 0x364   :  { %1054 = vmatpush.msra.mxu3 %v4118_v34  ;;  %788 = vmatmul.f32.vlgmr.msrb.gmra.mxu0 %v4057_v45 }
 0x365   :  { %949 = vmatpush.msra.mxu0 %v4246_v12  ;;  %974 = vmatpush.msra.mxu1 %v4118_v34  ;;  %v4331_v56 = vpop.permute.xlu0 %470  ;;  %v4350_v34 = vsub.f32 %v510_v5, %v4324_v27 }
 0x366   :  { %1024 = vmatpush.msra.mxu2 %v895_v37  ;;  %1056 = vmatpush.msra.mxu3 %v4178_v30  ;;  %486 = vst.msk [vmem:[#allocation3 + $0x138] sm:$0xff] %vm99_vm1, %v4331_v56  ;;  %v4341_v1 = vpop.permute.xlu1 %294  ;;  %v476_v55 = vsel %vm472_vm10, %v4260_v24, %v4331_v56 }
 0x367   :  { %818 = vmatmul.f32.vlgmr.msrb.gmra.mxu1 %v4057_v45  ;;  %852 = vmatmul.f32.vlgmr.msrb.gmra.mxu2 %v4145_v39  ;;  %v1115_v15 = vand.u32 4294901760, %v4350_v34  ;;  %v301_v28 = vsel %vm298_vm15, %v4203_v42, %v4341_v1  ;;  %v4472_v19 = vand.u32 4294901760, %v476_v55 }
 0x368   :  { %952 = vmatpush.msra.mxu0 %v4251_v22  ;;  %976 = vmatpush.msra.mxu1 %v4178_v30  ;;  %v4368_v30 = vsub.f32 %v475_v3, %v4345_v18  ;;  %v4413_v12 = vand.u32 4294901760, %v301_v28 }
 0x369   :  { %1028 = vmatpush.msra.mxu2 %v901_v26  ;;  %1058 = vmatpush.msra.mxu3 %v4180_v31  ;;  %v1116_v25 = vsub.f32 %v4350_v34, %v1115_v15  ;;  %v4428_v26 = vsub.f32 %v336_v61, %v4396_v47 }
 0x36a   :  { %918 = vmatmul.f32.vlgmr.msrb.gmra.mxu3 %v4057_v45  ;;  %955 = vmatpush.msra.mxu0 %v4226_v23  ;;  %v1121_v23 = vand.u32 4294901760, %v4368_v30  ;;  %v4446_v0 = vsub.f32 %v301_v28, %v4413_v12 }
 0x36b   :  { %978 = vmatpush.msra.mxu1 %v4180_v31  ;;  %1032 = vmatpush.msra.mxu2 %v907_v4  ;;  %v4380_v31 = vsub.f32 %v440_v41, %v4355_v49  ;;  %v1117_v4 = vand.u32 4294901760, %v1116_v25  ;;  %v1145_v63 = vand.u32 4294901760, %v4428_v26 }
 0x36c   :  { %1060 = vmatpush.msra.mxu3 %v4138_v59  ;;  %1080 = vmatpush.msrb.mxu0 %v4324_v27  ;;  %v1151_v56 = vand.u32 4294901760, %v4446_v0 }
 0x36d   :  { %980 = vmatpush.msra.mxu1 %v4138_v59  ;;  %1036 = vmatpush.msra.mxu2 %v913_v57  ;;  %v4384_v11 = vpop.permute.xlu0 %259  ;;  %v4392_v59 = vsub.f32 %v405_v40, %v4362_v52  ;;  %v4486_v40 = vand.u32 4294901760, %v441_v54 }
 0x36e   :  { %1062 = vmatpush.msra.mxu3 %v4233_v48  ;;  %1082 = vmatpush.msrb.mxu0 %v4345_v18  ;;  %v401_v37 = vpop.permute.xlu1 %400  ;;  %v266_v42 = vsel %vm263_vm3, %v4217_v29, %v4384_v11  ;;  %v1127_v29 = vand.u32 4294901760, %v4380_v31  ;;  %v1152_v60 = vsub.f32 %v4446_v0, %v1151_v56 }
 0x36f   :  { %1181 = vmatpush.msrb.mxu2 %v4350_v34  ;;  %982 = vmatpush.msra.mxu1 %v4233_v48  ;;  %416 = vst.msk [vmem:[#allocation3 + $0xe8] sm:$0xff] %vm99_vm1, %v401_v37  ;;  %v4411_v48 = vsub.f32 %v370_v35, %v4382_v62  ;;  %v1133_v22 = vand.u32 4294901760, %v4392_v59  ;;  %v4430_v57 = vand.u32 4294901760, %v266_v42  ;;  %v406_v5 = vsel %vm402_vm12, %v4100_v21, %v401_v37 }
 0x370   :  { %1064 = vmatpush.msra.mxu3 %v4241_v44  ;;  %1084 = vmatpush.msrb.mxu0 %v4355_v49  ;;  %v1128_v32 = vsub.f32 %v4380_v31, %v1127_v29  ;;  %v1146_v35 = vsub.f32 %v4428_v26, %v1145_v63  ;;  %v4495_v28 = vand.u32 4294901760, %v406_v5  ;;  %v4498_v37 = vsub.f32 %v476_v55, %v4472_v19 }
 0x371   :  { %1184 = vmatpush.msrb.mxu2 %v4368_v30  ;;  %984 = vmatpush.msra.mxu1 %v4241_v44  ;;  %v1122_v44 = vsub.f32 %v4368_v30, %v1121_v23  ;;  %v1134_v24 = vsub.f32 %v4392_v59, %v1133_v22  ;;  %v4462_v58 = vsub.f32 %v266_v42, %v4430_v57 }
 0x372   :  { %1038 = vmatmul.f32.vlgmr.msra.gmra.mxu2 %v4057_v45  ;;  %1066 = vmatpush.msra.mxu3 %v4193_v16  ;;  %v1129_v3 = vand.u32 4294901760, %v1128_v32  ;;  %v371_v42 = vsel %vm86_vm0, %v4292_v38, %v4262_v13  ;;  %v4512_v55 = vsub.f32 %v441_v54, %v4486_v40  ;;  %v1147_v38 = vand.u32 4294901760, %v1146_v35 }
 0x373   :  { %1086 = vmatpush.msrb.mxu0 %v4362_v52  ;;  %1187 = vmatpush.msrb.mxu2 %v4380_v31  ;;  %v1123_v51 = vand.u32 4294901760, %v1122_v44  ;;  %v1135_v21 = vand.u32 4294901760, %v1134_v24  ;;  %v1157_v61 = vand.u32 4294901760, %v4462_v58  ;;  %v1163_v44 = vand.u32 4294901760, %v4470_v53 }
 0x374   :  { %958 = vmatmul.f32.vlgmr.msra.gmra.mxu0 %v4079_v2  ;;  %986 = vmatpush.msra.mxu1 %v4193_v16  ;;  %v1139_v16 = vand.u32 4294901760, %v4411_v48  ;;  %v1371_v24 = vand.u32 4294901760, %v4498_v37  ;;  %v4524_v54 = vand.u32 4294901760, %v371_v42 }
 0x375   :  { %1068 = vmatmul.f32.vlgmr.msra.gmra.mxu3 %v4057_v45  ;;  %1088 = vmatpush.msrb.mxu0 %v4382_v62  ;;  %v332_v33 = vpop.permute.xlu0 %331  ;;  %v1158_v32 = vsub.f32 %v4462_v58, %v1157_v61 }
 0x376   :  { %1220 = vmatpush.msrb.mxu3 %v4324_v27  ;;  %1118 = vmatpush.msrb.mxu1 %v1117_v4  ;;  %347 = vst.msk [vmem:[#allocation3 + $0x98] sm:$0xff] %vm99_vm1, %v332_v33  ;;  %v297_v50 = vpop.permute.xlu1 %296  ;;  %v1140_v41 = vsub.f32 %v4411_v48, %v1139_v16  ;;  %v1365_v4 = vand.u32 4294901760, %v4484_v46  ;;  %v337_v13 = vsel %vm333_vm13, %v4149_v36, %v332_v33  ;;  %v1153_v33 = vand.u32 4294901760, %v1152_v60 }
 0x377   :  { %1190 = vmatpush.msrb.mxu2 %v4392_v59  ;;  %990 = vmatmul.f32.vlgmr.msra.gmra.mxu1 %v4096_v17  ;;  %312 = vst.msk [vmem:[#allocation3 + $0x70] sm:$0xff] %vm99_vm1, %v297_v50  ;;  %v302_v36 = vsel %vm298_vm15, %v4341_v1, %v297_v50  ;;  %v4542_v1 = vand.u32 4294901760, %v337_v13  ;;  %v267_v50 = vsel %vm263_vm3, %v4384_v11, %v4294_v14  ;;  %v236_v14 = vld [vmem:[#allocation2 + $0x18] sm:$0xff] }
 0x378   :  { %1222 = vmatpush.msrb.mxu3 %v4345_v18  ;;  %1090 = vmatpush.msrb.mxu0 %v4396_v47  ;;  %v1141_v25 = vand.u32 4294901760, %v1140_v41  ;;  %v1366_v34 = vsub.f32 %v4484_v46, %v1365_v4  ;;  %v1372_v30 = vsub.f32 %v4498_v37, %v1371_v24  ;;  %v4555_v41 = vand.u32 4294901760, %v302_v36 }
 0x379   :  { %1124 = vmatpush.msrb.mxu1 %v1123_v51  ;;  %1193 = vmatpush.msrb.mxu2 %v4411_v48  ;;  %v4527_v51 = vsub.f32 %v406_v5, %v4495_v28  ;;  %v1159_v5 = vand.u32 4294901760, %v1158_v32  ;;  %v4567_v35 = vand.u32 4294901760, %v267_v50 }
 0x37a   :  { %1224 = vmatpush.msrb.mxu3 %v4355_v49  ;;  %1092 = vmatpush.msrb.mxu0 %v4413_v12  ;;  %v1367_v31 = vand.u32 4294901760, %v1366_v34  ;;  %v1373_v59 = vand.u32 4294901760, %v1372_v30 }
 0x37b   :  { %1130 = vmatpush.msrb.mxu1 %v1129_v3  ;;  %1196 = vmatpush.msrb.mxu2 %v4428_v26  ;;  %v1164_v3 = vsub.f32 %v4470_v53, %v1163_v44 }
 0x37c   :  { %1226 = vmatpush.msrb.mxu3 %v4362_v52  ;;  %1094 = vmatpush.msrb.mxu0 %v4430_v57 }
 0x37d   :  { %1136 = vmatpush.msrb.mxu1 %v1135_v21  ;;  %1199 = vmatpush.msrb.mxu2 %v4446_v0  ;;  %v4558_v21 = vsub.f32 %v371_v42, %v4524_v54  ;;  %v1165_v11 = vand.u32 4294901760, %v1164_v3  ;;  %v4570_v42 = vsub.f32 %v337_v13, %v4542_v1  ;;  %v4590_v13 = vsub.f32 %v267_v50, %v4567_v35  ;;  %v532_v50 = vld [vmem:[#allocation3 + $0x48] sm:$0xff] }
 0x37e   :  { %1228 = vmatpush.msrb.mxu3 %v4382_v62  ;;  %1096 = vmatpush.msrb.mxu0 %v4435_v43 }
 0x37f   :  { %1142 = vmatpush.msrb.mxu1 %v1141_v25  ;;  %1202 = vmatpush.msrb.mxu2 %v4462_v58  ;;  %v4573_v25 = vand.u32 4294901760, %v236_v14  ;;  %v1389_v60 = vand.u32 4294901760, %v4558_v21  ;;  %v1407_v0 = vand.u32 4294901760, %v4590_v13 }
 0x380   :  { %1230 = vmatpush.msrb.mxu3 %v4396_v47  ;;  %1254 = vmatpush.msra.mxu0 %v1115_v15  ;;  %v1377_v15 = vand.u32 4294901760, %v4512_v55 }
 0x381   :  { %1148 = vmatpush.msrb.mxu1 %v1147_v38  ;;  %1205 = vmatpush.msrb.mxu2 %v4470_v53  ;;  %v4582_v38 = vsub.f32 %v302_v36, %v4555_v41  ;;  %v1390_v26 = vsub.f32 %v4558_v21, %v1389_v60  ;;  %v4601_v32 = vsub.f32 %v236_v14, %v4573_v25 }
 0x382   :  { %1232 = vmatpush.msrb.mxu3 %v4413_v12  ;;  %1258 = vmatpush.msra.mxu0 %v1121_v23  ;;  %v1383_v23 = vand.u32 4294901760, %v4527_v51  ;;  %v1408_v58 = vsub.f32 %v4590_v13, %v1407_v0 }
 0x383   :  { %1330 = vmatpush.msra.mxu2 %v4453_v20  ;;  %1154 = vmatpush.msrb.mxu1 %v1153_v33  ;;  %v1413_v36 = vand.u32 4294901760, %v4601_v32  ;;  %v537_v33 = vld [vmem:[#allocation3 + $0x70] sm:$0xff] }
 0x384   :  { %1234 = vmatpush.msrb.mxu3 %v4430_v57  ;;  %1262 = vmatpush.msra.mxu0 %v1127_v29  ;;  %v1378_v29 = vsub.f32 %v4512_v55, %v1377_v15  ;;  %v4720_v30 = vand.u32 4294901760, %v537_v33 }
 0x385   :  { %1332 = vmatpush.msra.mxu2 %v4472_v19  ;;  %1160 = vmatpush.msrb.mxu1 %v1159_v5  ;;  %v1414_v53 = vsub.f32 %v4601_v32, %v1413_v36 }
 0x386   :  { %1236 = vmatpush.msrb.mxu3 %v4435_v43  ;;  %1266 = vmatpush.msra.mxu0 %v1133_v22  ;;  %v1384_v22 = vsub.f32 %v4527_v51, %v1383_v23  ;;  %v1379_v48 = vand.u32 4294901760, %v1378_v29 }
 0x387   :  { %1334 = vmatpush.msra.mxu2 %v4486_v40  ;;  %1166 = vmatpush.msrb.mxu1 %v1165_v11  ;;  %v4733_v11 = vand.u32 4294901760, %v532_v50 }
 0x388   :  { %1368 = vmatpush.msra.mxu3 %v1367_v31  ;;  %1270 = vmatpush.msra.mxu0 %v1139_v16  ;;  %v1395_v16 = vand.u32 4294901760, %v4570_v42 }
 0x389   :  { %1300 = vmatpush.msra.mxu1 %v4324_v27  ;;  %1336 = vmatpush.msra.mxu2 %v4495_v28  ;;  %v1385_v27 = vand.u32 4294901760, %v1384_v22 }
 0x38a   :  { %1374 = vmatpush.msra.mxu3 %v1373_v59  ;;  %1274 = vmatpush.msra.mxu0 %v1145_v63  ;;  %v1401_v63 = vand.u32 4294901760, %v4582_v38 }
 0x38b   :  { %1302 = vmatpush.msra.mxu1 %v4345_v18  ;;  %1338 = vmatpush.msra.mxu2 %v4524_v54  ;;  %v1396_v18 = vsub.f32 %v4570_v42, %v1395_v16 }
 0x38c   :  { %1380 = vmatpush.msra.mxu3 %v1379_v48  ;;  %1278 = vmatpush.msra.mxu0 %v1151_v56  ;;  %v1402_v56 = vsub.f32 %v4582_v38, %v1401_v63 }
 0x38d   :  { %1304 = vmatpush.msra.mxu1 %v4355_v49  ;;  %1340 = vmatpush.msra.mxu2 %v4542_v1  ;;  %v1391_v49 = vand.u32 4294901760, %v1390_v26 }
 0x38e   :  { %1208 = vmatmul.f32.vlgmr.msrb.gmra.mxu2 %v4079_v2  ;;  %1386 = vmatpush.msra.mxu3 %v1385_v27 }
 0x38f   :  { %1282 = vmatpush.msra.mxu0 %v1157_v61  ;;  %1306 = vmatpush.msra.mxu1 %v4362_v52  ;;  %v1397_v52 = vand.u32 4294901760, %v1396_v18  ;;  %v1403_v61 = vand.u32 4294901760, %v1402_v56 }
 0x390   :  { %1342 = vmatpush.msra.mxu2 %v4555_v41  ;;  %1102 = vmatmul.f32.vlgmr.msrb.gmra.mxu0 %v4145_v39 }
 0x391   :  { %1240 = vmatmul.f32.vlgmr.msrb.gmra.mxu3 %v4096_v17  ;;  %1286 = vmatpush.msra.mxu0 %v1163_v44  ;;  %v1415_v44 = vand.u32 4294901760, %v1414_v53 }
 0x392   :  { %1392 = vmatpush.msra.mxu3 %v1391_v49  ;;  %1308 = vmatpush.msra.mxu1 %v4382_v62  ;;  %v1409_v62 = vand.u32 4294901760, %v1408_v58 }
 0x393   :  { %1344 = vmatpush.msra.mxu2 %v4567_v35  ;;  %1168 = vmatmul.f32.vlgmr.msrb.gmra.mxu1 %v4057_v45 }
 0x394   :  { %1398 = vmatpush.msra.mxu3 %v1397_v52  ;;  %1431 = vmatpush.msrb.mxu0 %v4484_v46  ;;  %v552_v46 = vld [vmem:[#allocation3 + $0xe8] sm:$0xff] }
 0x395   :  { %1310 = vmatpush.msra.mxu1 %v4396_v47  ;;  %1346 = vmatpush.msra.mxu2 %v4573_v25  ;;  %v567_v47 = vld [vmem:[#allocation3 + $0x160] sm:$0xff] }
 0x396   :  { %1404 = vmatpush.msra.mxu3 %v1403_v61  ;;  %1434 = vmatpush.msrb.mxu0 %v4498_v37  ;;  %v547_v37 = vld [vmem:[#allocation3 + $0xc0] sm:$0xff] }
 0x397   :  { %1504 = vmatpush.msrb.mxu2 %v1365_v4  ;;  %1312 = vmatpush.msra.mxu1 %v4413_v12  ;;  %v4658_v12 = vand.u32 4294901760, %v567_v47  ;;  %v4687_v4 = vand.u32 4294901760, %v552_v46 }
 0x398   :  { %1410 = vmatpush.msra.mxu3 %v1409_v62  ;;  %1437 = vmatpush.msrb.mxu0 %v4512_v55 }
 0x399   :  { %1508 = vmatpush.msrb.mxu2 %v1371_v24  ;;  %1314 = vmatpush.msra.mxu1 %v4430_v57  ;;  %v562_v57 = vld [vmem:[#allocation3 + $0x138] sm:$0xff]  ;;  %v4705_v3 = vsub.f32 %v552_v46, %v4687_v4 }
 0x39a   :  { %1288 = vmatmul.f32.vlgmr.msra.gmra.mxu0 %v4057_v45  ;;  %1416 = vmatpush.msra.mxu3 %v1415_v44  ;;  %v542_v24 = vld [vmem:[#allocation3 + $0x98] sm:$0xff] }
 0x39b   :  { %1440 = vmatpush.msrb.mxu0 %v4527_v51  ;;  %1512 = vmatpush.msrb.mxu2 %v1377_v15  ;;  %v4698_v51 = vand.u32 4294901760, %v547_v37  ;;  %v4707_v34 = vand.u32 4294901760, %v542_v24  ;;  %v1633_v31 = vand.u32 4294901760, %v4705_v3 }
 0x39c   :  { %1316 = vmatpush.msra.mxu1 %v4435_v43  ;;  %1550 = vmatpush.msrb.mxu3 %v4453_v20  ;;  %v557_v43 = vld [vmem:[#allocation3 + $0x110] sm:$0xff] }
 0x39d   :  { %1318 = vmatmul.f32.vlgmr.msra.gmra.mxu1 %v4057_v45  ;;  %1443 = vmatpush.msrb.mxu0 %v4558_v21  ;;  %v4718_v5 = vsub.f32 %v547_v37, %v4698_v51  ;;  %v4731_v14 = vsub.f32 %v542_v24, %v4707_v34 }
 0x39e   :  { %1470 = vmatpush.msrb.mxu1 %v4453_v20  ;;  %1516 = vmatpush.msrb.mxu2 %v1383_v23  ;;  %v4667_v20 = vand.u32 4294901760, %v562_v57 }
 0x39f   :  { %1552 = vmatpush.msrb.mxu3 %v4472_v19  ;;  %1446 = vmatpush.msrb.mxu0 %v4570_v42  ;;  %v4744_v42 = vsub.f32 %v537_v33, %v4720_v30  ;;  %v1639_v22 = vand.u32 4294901760, %v4718_v5  ;;  %v1645_v48 = vand.u32 4294901760, %v4731_v14 }
 0x3a0   :  { %1472 = vmatpush.msrb.mxu1 %v4472_v19  ;;  %1520 = vmatpush.msrb.mxu2 %v1389_v60  ;;  %v4672_v19 = vsub.f32 %v567_v47, %v4658_v12  ;;  %v1634_v60 = vsub.f32 %v4705_v3, %v1633_v31 }
 0x3a1   :  { %1554 = vmatpush.msrb.mxu3 %v4486_v40  ;;  %1449 = vmatpush.msrb.mxu0 %v4582_v38  ;;  %v1656_v38 = vsub.f32 %v532_v50, %v4733_v11  ;;  %v1651_v26 = vand.u32 4294901760, %v4744_v42 }
 0x3a2   :  { %1474 = vmatpush.msrb.mxu1 %v4486_v40  ;;  %1524 = vmatpush.msrb.mxu2 %v1395_v16  ;;  %v4677_v40 = vand.u32 4294901760, %v557_v43  ;;  %v1615_v55 = vand.u32 4294901760, %v4672_v19 }
 0x3a3   :  { %1556 = vmatpush.msrb.mxu3 %v4495_v28  ;;  %1352 = vmatmul.f32.vlgmr.msra.gmra.mxu2 %v4145_v39  ;;  %v1657_v18 = vand.u32 4294901760, %v1656_v38  ;;  %v1652_v49 = vsub.f32 %v4744_v42, %v1651_v26 }
 0x3a4   :  { %1452 = vmatpush.msrb.mxu0 %v4590_v13  ;;  %1476 = vmatpush.msrb.mxu1 %v4495_v28  ;;  %v4685_v28 = vsub.f32 %v562_v57, %v4667_v20  ;;  %v1640_v13 = vsub.f32 %v4718_v5, %v1639_v22 }
 0x3a5   :  { %1528 = vmatpush.msrb.mxu2 %v1401_v63  ;;  %1558 = vmatpush.msrb.mxu3 %v4524_v54  ;;  %v1635_v63 = vand.u32 4294901760, %v1634_v60  ;;  %v1658_v52 = vsub.f32 %v1656_v38, %v1657_v18  ;;  %v1653_v58 = vand.u32 4294901760, %v1652_v49 }
 0x3a6   :  { %1418 = vmatmul.f32.vlgmr.msra.gmra.mxu3 %v4057_v45  ;;  %1455 = vmatpush.msrb.mxu0 %v4601_v32  ;;  %v1621_v15 = vand.u32 4294901760, %v4685_v28  ;;  %v1646_v32 = vsub.f32 %v4731_v14, %v1645_v48 }
 0x3a7   :  { %1478 = vmatpush.msrb.mxu1 %v4524_v54  ;;  %1532 = vmatpush.msrb.mxu2 %v1407_v0  ;;  %v4696_v54 = vsub.f32 %v557_v43, %v4677_v40  ;;  %v1641_v0 = vand.u32 4294901760, %v1640_v13  ;;  %v1659_v53 = vand.u32 4294901760, %v1658_v52 }
 0x3a8   :  { %1560 = vmatpush.msrb.mxu3 %v4542_v1  ;;  %1580 = vmatpush.msra.mxu0 %v4658_v12  ;;  %v1622_v21 = vsub.f32 %v4685_v28, %v1621_v15 }
 0x3a9   :  { %1480 = vmatpush.msrb.mxu1 %v4542_v1  ;;  %1536 = vmatpush.msrb.mxu2 %v1413_v36  ;;  %v1616_v1 = vsub.f32 %v4672_v19, %v1615_v55  ;;  %v1627_v23 = vand.u32 4294901760, %v4696_v54  ;;  %v1647_v36 = vand.u32 4294901760, %v1646_v32 }
 0x3aa   :  { %1562 = vmatpush.msrb.mxu3 %v4555_v41  ;;  %1582 = vmatpush.msra.mxu0 %v4667_v20 }
 0x3ab   :  { %1681 = vmatpush.msra.mxu2 %v4672_v19  ;;  %1482 = vmatpush.msrb.mxu1 %v4555_v41  ;;  %v527_v41 = vld [vmem:[#allocation3 + $0x20] sm:$0xff]  ;;  %v1617_v29 = vand.u32 4294901760, %v1616_v1 }
 0x3ac   :  { %1564 = vmatpush.msrb.mxu3 %v4567_v35  ;;  %1584 = vmatpush.msra.mxu0 %v4677_v40  ;;  %v4746_v59 = vand.u32 4294901760, %v527_v41 }
 0x3ad   :  { %1684 = vmatpush.msra.mxu2 %v4685_v28  ;;  %1484 = vmatpush.msrb.mxu1 %v4567_v35  ;;  %v1628_v35 = vsub.f32 %v4696_v54, %v1627_v23 }
 0x3ae   :  { %1538 = vmatmul.f32.vlgmr.msrb.gmra.mxu2 %v4057_v45  ;;  %1566 = vmatpush.msrb.mxu3 %v4573_v25  ;;  %v1662_v27 = vsub.f32 %v527_v41, %v4746_v59 }
 0x3af   :  { %1586 = vmatpush.msra.mxu0 %v4687_v4  ;;  %1687 = vmatpush.msra.mxu2 %v4696_v54  ;;  %v1629_v16 = vand.u32 4294901760, %v1628_v35 }
 0x3b0   :  { %1458 = vmatmul.f32.vlgmr.msrb.gmra.mxu0 %v4079_v2  ;;  %1486 = vmatpush.msrb.mxu1 %v4573_v25  ;;  %v1623_v25 = vand.u32 4294901760, %v1622_v21  ;;  %v1663_v56 = vand.u32 4294901760, %v1662_v27 }
 0x3b1   :  { %1568 = vmatmul.f32.vlgmr.msrb.gmra.mxu3 %v4057_v45  ;;  %1588 = vmatpush.msra.mxu0 %v4698_v51 }
 0x3b2   :  { %1720 = vmatpush.msra.mxu3 %v4658_v12  ;;  %1618 = vmatpush.msra.mxu1 %v1617_v29  ;;  %v1664_v61 = vsub.f32 %v1662_v27, %v1663_v56 }
 0x3b3   :  { %1690 = vmatpush.msra.mxu2 %v4705_v3  ;;  %1490 = vmatmul.f32.vlgmr.msrb.gmra.mxu1 %v4096_v17 }
 0x3b4   :  { %1722 = vmatpush.msra.mxu3 %v4667_v20  ;;  %1590 = vmatpush.msra.mxu0 %v4707_v34  ;;  %v1665_v62 = vand.u32 4294901760, %v1664_v61 }
 0x3b5   :  { %1624 = vmatpush.msra.mxu1 %v1623_v25  ;;  %1693 = vmatpush.msra.mxu2 %v4718_v5 }
 0x3b6   :  { %1724 = vmatpush.msra.mxu3 %v4677_v40  ;;  %1592 = vmatpush.msra.mxu0 %v4720_v30 }
 0x3b7   :  { %1630 = vmatpush.msra.mxu1 %v1629_v16  ;;  %1696 = vmatpush.msra.mxu2 %v4731_v14 }
 0x3b8   :  { %1726 = vmatpush.msra.mxu3 %v4687_v4  ;;  %1594 = vmatpush.msra.mxu0 %v4733_v11 }
 0x3b9   :  { %1636 = vmatpush.msra.mxu1 %v1635_v63  ;;  %1699 = vmatpush.msra.mxu2 %v4744_v42 }
 0x3ba   :  { %1728 = vmatpush.msra.mxu3 %v4698_v51  ;;  %1596 = vmatpush.msra.mxu0 %v4746_v59 }
 0x3bb   :  { %1642 = vmatpush.msra.mxu1 %v1641_v0  ;;  %1702 = vmatpush.msra.mxu2 %v1656_v38 }
 0x3bc   :  { %1730 = vmatpush.msra.mxu3 %v4707_v34  ;;  %1754 = vmatpush.msrb.mxu0 %v1615_v55 }
 0x3bd   :  { %1648 = vmatpush.msra.mxu1 %v1647_v36  ;;  %1705 = vmatpush.msra.mxu2 %v1662_v27 }
 0x3be   :  { %1732 = vmatpush.msra.mxu3 %v4720_v30  ;;  %1758 = vmatpush.msrb.mxu0 %v1621_v15 }
 0x3bf   :  { %1654 = vmatpush.msra.mxu1 %v1653_v58  ;;  %1708 = vmatmul.f32.vlgmr.msra.gmra.mxu2 %v4079_v2 }
 0x3c0   :  { %1734 = vmatpush.msra.mxu3 %v4733_v11  ;;  %1762 = vmatpush.msrb.mxu0 %v1627_v23 }
 0x3c1   :  { %1660 = vmatpush.msra.mxu1 %v1659_v53  ;;  %1602 = vmatmul.f32.vlgmr.msra.gmra.mxu0 %v4145_v39 }
 0x3c2   :  { %1736 = vmatpush.msra.mxu3 %v4746_v59  ;;  %1766 = vmatpush.msrb.mxu0 %v1633_v31 }
 0x3c3   :  { %1666 = vmatpush.msra.mxu1 %v1665_v62  ;;  %1740 = vmatmul.f32.vlgmr.msra.gmra.mxu3 %v4096_v17  ;;  %v603_v17 = vpop.f32.mrf.mxu0 }
 0x3c4   :  { %1770 = vmatpush.msrb.mxu0 %v1639_v22  ;;  %1668 = vmatmul.f32.vlgmr.msra.gmra.mxu1 %v4057_v45 }
 0x3c5   :  { %1800 = vmatpush.msrb.mxu1 %v4658_v12 }
 0x3c6   :  { %1774 = vmatpush.msrb.mxu0 %v1645_v48 }
 0x3c7   :  { %1802 = vmatpush.msrb.mxu1 %v4667_v20 }
 0x3c8   :  { %1778 = vmatpush.msrb.mxu0 %v1651_v26 }
 0x3c9   :  { %1804 = vmatpush.msrb.mxu1 %v4677_v40 }
 0x3ca   :  { %1782 = vmatpush.msrb.mxu0 %v1657_v18  ;;  %v709_v39 = vpop.f32.mrf.mxu2 }
 0x3cb   :  { %1806 = vmatpush.msrb.mxu1 %v4687_v4 }
 0x3cc   :  { %1786 = vmatpush.msrb.mxu0 %v1663_v56 }
 0x3cd   :  { %1808 = vmatpush.msrb.mxu1 %v4698_v51  ;;  %1788 = vmatmul.f32.vlgmr.msrb.gmra.mxu0 %v4057_v45  ;;  %v669_v2 = vpop.f32.mrf.mxu1 }
 0x3cf   :  { %1810 = vmatpush.msrb.mxu1 %v4707_v34  ;;  %v670_v34 = vadd.f32 %v669_v2, %v603_v17 }
 0x3d0   :  { %v741_v44 = vpop.f32.mrf.mxu3 }
 0x3d1   :  { %1812 = vmatpush.msrb.mxu1 %v4720_v30  ;;  %v710_v23 = vadd.f32 %v709_v39, %v670_v34 }
 0x3d3   :  { %1814 = vmatpush.msrb.mxu1 %v4733_v11  ;;  %v742_v29 = vadd.f32 %v741_v44, %v710_v23 }
 0x3d5   :  { %1816 = vmatpush.msrb.mxu1 %v4746_v59 }
 0x3d6   :  { %1818 = vmatmul.f32.vlgmr.msrb.gmra.mxu1 %v4057_v45 }
 0x3e1   :  { %v789_v12 = vpop.f32.mrf.mxu0 }
 0x3e2   :  { %v790_v38 = vadd.f32 %v789_v12, %v742_v29 }
 0x3e4   :  { %v819_v47 = vpop.f32.mrf.mxu1 }
 0x3e5   :  { %v820_v63 = vadd.f32 %v819_v47, %v790_v38 }
 0x3e7   :  { %v1822_v36 = vmul.f32 %v820_v63, %v3791_v6 }
 0x3ea   :  { %v853_v57 = vpop.f32.mrf.mxu2 }
 0x3ed   :  { %v919_v43 = vpop.f32.mrf.mxu3 }
 0x3ee   :  { %v920_v33 = vadd.f32 %v919_v43, %v853_v57 }
 0x3f1   :  { %v959_v19 = vpop.f32.mrf.mxu0 }
 0x3f2   :  { %v960_v50 = vadd.f32 %v959_v19, %v920_v33 }
 0x3f4   :  { %v991_v20 = vpop.f32.mrf.mxu1 }
 0x3f5   :  { %v1039_v46 = vpop.f32.mrf.mxu2  ;;  %v992_v21 = vadd.f32 %v991_v20, %v960_v50 }
 0x3f7   :  { %v1040_v22 = vadd.f32 %v1039_v46, %v992_v21 }
 0x3f8   :  { %v1069_v40 = vpop.f32.mrf.mxu3 }
 0x3f9   :  { %v1070_v13 = vadd.f32 %v1069_v40, %v1040_v22 }
 0x3fb   :  { %v1823_v0 = vmul.f32 %v1070_v13, %v3795_v7 }
 0x3fd   :  { %v1827_v61 = vadd.f32 %v1823_v0, %v1822_v36 }
 0x40d   :  { %v1103_v28 = vpop.f32.mrf.mxu0 }
 0x410   :  { %v1169_v37 = vpop.f32.mrf.mxu1 }
 0x411   :  { %v1209_v4 = vpop.f32.mrf.mxu2  ;;  %v1170_v15 = vadd.f32 %v1169_v37, %v1103_v28 }
 0x413   :  { %v1210_v41 = vadd.f32 %v1209_v4, %v1170_v15 }
 0x414   :  { %v1241_v55 = vpop.f32.mrf.mxu3 }
 0x415   :  { %v1242_v35 = vadd.f32 %v1241_v55, %v1210_v41 }
 0x417   :  { %v1289_v54 = vpop.f32.mrf.mxu0 }
 0x418   :  { %v1290_v48 = vadd.f32 %v1289_v54, %v1242_v35 }
 0x41a   :  { %v1319_v24 = vpop.f32.mrf.mxu1 }
 0x41b   :  { %v1320_v32 = vadd.f32 %v1319_v24, %v1290_v48 }
 0x41d   :  { %v1824_v52 = vmul.f32 %v1320_v32, %v3797_v8 }
 0x41f   :  { %v1828_v17 = vadd.f32 %v1827_v61, %v1824_v52 }
 0x426   :  { %v1353_v51 = vpop.f32.mrf.mxu2 }
 0x429   :  { %v1419_v45 = vpop.f32.mrf.mxu3 }
 0x42a   :  { %v1420_v5 = vadd.f32 %v1419_v45, %v1353_v51 }
 0x42d   :  { %v1459_v1 = vpop.f32.mrf.mxu0 }
 0x42e   :  { %v1460_v14 = vadd.f32 %v1459_v1, %v1420_v5 }
 0x430   :  { %v1491_v3 = vpop.f32.mrf.mxu1 }
 0x431   :  { %v1539_v30 = vpop.f32.mrf.mxu2  ;;  %v1492_v25 = vadd.f32 %v1491_v3, %v1460_v14 }
 0x433   :  { %v1540_v27 = vadd.f32 %v1539_v30, %v1492_v25 }
 0x434   :  { %v1569_v11 = vpop.f32.mrf.mxu3 }
 0x435   :  { %v1570_v49 = vadd.f32 %v1569_v11, %v1540_v27 }
 0x437   :  { %v1825_v53 = vmul.f32 %v1570_v49, %v3803_v9 }
 0x439   :  { %v1829_v44 = vadd.f32 %v1828_v17, %v1825_v53 }
 0x43e   :  { %v1603_v42 = vpop.f32.mrf.mxu0 }
 0x441   :  { %v1669_v31 = vpop.f32.mrf.mxu1 }
 0x442   :  { %v1670_v59 = vadd.f32 %v1669_v31, %v1603_v42  ;;  %v1709_v60 = vpop.f32.mrf.mxu2  ;;  %v1858_v42 = vld [vmem:[%s5824_s5] sm:$0xff] }
 0x444   :  { %v1710_v16 = vadd.f32 %v1709_v60, %v1670_v59  ;;  %v1881_v60 = vld [vmem:[%s5825_s6] sm:$0xff] }
 0x446   :  { %v1741_v26 = vpop.f32.mrf.mxu3 }
 0x447   :  { %v1742_v18 = vadd.f32 %v1741_v26, %v1710_v16 }
 0x44a   :  { %v1789_v56 = vpop.f32.mrf.mxu0 }
 0x44b   :  { %v1790_v58 = vadd.f32 %v1789_v56, %v1742_v18 }
 0x453   :  { %v1819_v62 = vpop.f32.mrf.mxu1 }
 0x454   :  { %v1820_v2 = vadd.f32 %v1819_v62, %v1790_v58 }
 0x456   :  { %v1826_v39 = vmul.f32 %v1820_v2, %v3805_v10 }
 0x458   :  { %v1830_v47 = vsel %vm99_vm1, %v1826_v39, 0.0 }
 0x459   :  { %v1831_v12 = vadd.f32 %v1830_v47, %v1829_v44 }
 0x45b   :  { %1832 = vadd.xlane.f32.xlu0 %v1831_v12 }
 0x4ce   :  { %v1833_v57 = vpop.xlane.xlu0 %1832 }
 0x4cf   :  { %v1834_v43 = vmul.f32 0.001953125, %v1833_v57 }
 0x4d1   :  { %v1835_v20 = vsub.f32 %v1822_v36, %v1834_v43  ;;  %v1836_v19 = vsub.f32 %v1823_v0, %v1834_v43  ;;  %v1837_v46 = vsub.f32 %v1824_v52, %v1834_v43  ;;  %v1838_v40 = vsub.f32 %v1825_v53, %v1834_v43 }
 0x4d2   :  { %v1839_v37 = vsub.f32 %v1826_v39, %v1834_v43 }
 0x4d3   :  { %v1840_v28 = vmul.f32 %v1835_v20, %v3791_v6  ;;  %v1841_v4 = vmul.f32 %v1836_v19, %v3795_v7  ;;  %v1842_v55 = vmul.f32 %v1837_v46, %v3797_v8  ;;  %v1843_v54 = vmul.f32 %v1838_v40, %v3803_v9 }
 0x4d4   :  { %v1844_v24 = vmul.f32 %v1839_v37, %v3805_v10 }
 0x4d5   :  { %v1845_v51 = vmul.f32 %v1840_v28, %v1840_v28  ;;  %v1846_v45 = vmul.f32 %v1841_v4, %v1841_v4  ;;  %v1847_v33 = vmul.f32 %v1842_v55, %v1842_v55  ;;  %v1848_v15 = vmul.f32 %v1843_v54, %v1843_v54 }
 0x4d6   :  { %v1849_v34 = vmul.f32 %v1844_v24, %v1844_v24 }
 0x4d7   :  { %v1850_v3 = vadd.f32 %v1846_v45, %v1845_v51 }
 0x4d8   :  { %v1853_v5 = vsel %vm99_vm1, %v1849_v34, 0.0 }
 0x4d9   :  { %v1851_v1 = vadd.f32 %v1850_v3, %v1847_v33 }
 0x4db   :  { %v1852_v50 = vadd.f32 %v1851_v1, %v1848_v15 }
 0x4dd   :  { %v1854_v30 = vadd.f32 %v1853_v5, %v1852_v50 }
 0x4df   :  { %1855 = vadd.xlane.f32.xlu1 %v1854_v30 }
 0x552   :  { %v1856_v23 = vpop.xlane.xlu1 %1855 }
 0x553   :  { %v1857_v41 = vmul.f32 0.001953125, %v1856_v23 }
 0x555   :  { %v1859_v21 = vadd.f32 1e-05, %v1857_v41 }
 0x557   :  { %3613 = vrsqrt.f32 %v1859_v21  ;;  %vm1866_vm5 = vweird.f32 %v1859_v21 }
 0x55d   :  { %v3614_v14 = vpop.eup %3613 }
 0x55e   :  { %v1861_v11 = vmul.f32 %v3614_v14, %v1859_v21  ;;  %vm1867_vm4 = vweird.f32 %v3614_v14 }
 0x55f   :  { %vm1868_vm6 = vmor %vm1866_vm5, %vm1867_vm4 }
 0x560   :  { %v1862_v31 = vmul.f32 %v3614_v14, %v1861_v11 }
 0x562   :  { %v1863_v29 = vmul.f32 0.5, %v1862_v31 }
 0x564   :  { %v1864_v35 = vsub.f32 1.5, %v1863_v29  ;;  %v2213_v29 = vld [vmem:[#allocation7] sm:$0xff] }
 0x566   :  { %v1865_v59 = vmul.f32 %v3614_v14, %v1864_v35 }
 0x568   :  { %v1869_v22 = vsel %vm1868_vm6, %v3614_v14, %v1865_v59 }
 0x569   :  { %v1870_v25 = vmul.f32 %v1869_v22, %v1858_v42  ;;  %v2266_v22 = vsel %vm568_vm14, %v2213_v29, 0 }
 0x56b   :  { %1873 = vperm.xlu2 %3610, %v1870_v25  }
 0x573   :  { %1884 = vperm.xlu2 %3610, %v1881_v60  }
 0x5c5   :  { %v1874_v38 = vpop.permute.xlu2 %1873 }
 0x5c6   :  { %v1880_v48 = vmul.f32 %v1874_v38, %v1844_v24  ;;  %v1876_v16 = vmul.f32 %v1874_v38, %v1840_v28  ;;  %v1877_v18 = vmul.f32 %v1874_v38, %v1841_v4  ;;  %v1878_v52 = vmul.f32 %v1874_v38, %v1842_v55  ;;  %v2259_v55 = vld [vmem:[%s5827_s8] sm:$0xff] }
 0x5c7   :  { %v1879_v62 = vmul.f32 %v1874_v38, %v1843_v54 }
 0x5cd   :  { %v1885_v13 = vpop.permute.xlu2 %1884 }
 0x5ce   :  { %v1891_v27 = vadd.f32 %v1885_v13, %v1880_v48  ;;  %v1887_v26 = vadd.f32 %v1885_v13, %v1876_v16  ;;  %v1888_v56 = vadd.f32 %v1885_v13, %v1877_v18  ;;  %v1889_v61 = vadd.f32 %v1885_v13, %v1878_v52 }
 0x5cf   :  { %v1890_v17 = vadd.f32 %v1885_v13, %v1879_v62  ;;  %v4949_v16 = vand.u32 4294901760, %v2266_v22 }
 0x5d0   :  { %v1896_v63 = vmax.f32 %v1891_v27, 0.0  ;;  %v1892_v32 = vmax.f32 %v1887_v26, 0.0  ;;  %v1893_v36 = vmax.f32 %v1888_v56, 0.0  ;;  %v1894_v53 = vmax.f32 %v1889_v61, 0.0 }
 0x5d2   :  { %v1901_v0 = vmul.f32 %v1896_v63, %v3805_v10  ;;  %v1897_v49 = vmul.f32 %v1892_v32, %v3791_v6  ;;  %v1898_v58 = vmul.f32 %v1893_v36, %v3795_v7  ;;  %v1899_v2 = vmul.f32 %v1894_v53, %v3797_v8 }
 0x5d3   :  { %v1895_v6 = vmax.f32 %v1890_v17, 0.0 }
 0x5d4   :  { %1915 = vrot.lane.b32.xlu0 %v1901_v0, %s3701_s28  ;;  %1907 = vrot.lane.b32.xlu2 %v1897_v49, %s3701_s28 }
 0x5d5   :  { %v1900_v10 = vmul.f32 %v1895_v6, %v3803_v9 }
 0x5dc   :  { %1909 = vrot.lane.b32.xlu2 %v1898_v58, %s3701_s28  ;;  %v4975_v58 = vsub.f32 %v2266_v22, %v4949_v16 }
 0x5e4   :  { %1911 = vrot.lane.b32.xlu2 %v1899_v2, %s3701_s28 }
 0x5ec   :  { %1913 = vrot.lane.b32.xlu2 %v1900_v10, %s3701_s28 }
 0x62e   :  { %v1908_v39 = vpop.permute.xlu2 %1907 }
 0x62f   :  { %1926 = vst.msk [vmem:[#allocation2] sm:$0xff] %vm226_vm7, %v1908_v39 }
 0x636   :  { %v1910_v44 = vpop.permute.xlu2 %1909  ;;  %v4825_v7 = vld [vmem:[#allocation2] sm:$0xff] }
 0x637   :  { %v4828_v47 = vsel %vm62_vm2, %v1908_v39, %v1910_v44  ;;  %2189 = vrot.lane.b32.xlu1 %v4825_v7, %s3704_s2  ;;  %2155 = vrot.lane.b32.xlu2 %v4825_v7, %s3705_s3 }
 0x638   :  { %2087 = vrot.lane.b32.xlu0 %v4825_v7, %s3707_s13 }
 0x63e   :  { %v1912_v8 = vpop.permute.xlu2 %1911 }
 0x63f   :  { %v4837_v9 = vsel %vm62_vm2, %v1910_v44, %v1912_v8  ;;  %2121 = vrot.lane.b32.xlu2 %v4825_v7, %s3706_s12  ;;  %2053 = vrot.lane.b32.xlu1 %v4825_v7, %s3700_s22 }
 0x640   :  { %1985 = vrot.lane.b32.xlu0 %v4825_v7, %s3709_s15 }
 0x646   :  { %v1916_v12 = vpop.permute.xlu0 %1915  ;;  %v1914_v57 = vpop.permute.xlu2 %1913 }
 0x647   :  { %v1919_v43 = vsel %vm62_vm2, %v1912_v8, %v1914_v57  ;;  %v1920_v20 = vsel %vm62_vm2, %v1914_v57, %v1916_v12  ;;  %2019 = vrot.lane.b32.xlu2 %v4825_v7, %s3708_s14  ;;  %1951 = vrot.lane.b32.xlu1 %v4825_v7, %s3710_s16  ;;  %v5003_v8 = vand.u32 4294901760, %v4825_v7  ;;  %v5006_v12 = vand.u32 4294901760, %v4975_v58 }
 0x648   :  { %1929 = vst [vmem:[#allocation2 + $0x18] sm:$0xff] %v1919_v43  ;;  %2157 = vrot.lane.b32.xlu0 %v4828_v47, %s3705_s3 }
 0x649   :  { %1930 = vst.msk [vmem:[#allocation2 + $0x20] sm:$0xff] %vm231_vm8, %v1920_v20 }
 0x64f   :  { %2191 = vrot.lane.b32.xlu2 %v4828_v47, %s3704_s2  ;;  %2123 = vrot.lane.b32.xlu1 %v4828_v47, %s3706_s12  ;;  %v4858_v19 = vld [vmem:[#allocation2 + $0x18] sm:$0xff] }
 0x650   :  { %2055 = vrot.lane.b32.xlu0 %v4828_v47, %s3700_s22  ;;  %v1935_v46 = vld [vmem:[#allocation2 + $0x20] sm:$0xff] }
 0x651   :  { %1940 = vst.msk [vmem:[#allocation3 + $0x20] sm:$0xff] %vm99_vm1, %v1935_v46  ;;  %v2183_v40 = vld [vmem:[#allocation2 + $0x20] sm:$0xff] }
 0x657   :  { %2089 = vrot.lane.b32.xlu2 %v4828_v47, %s3707_s13  ;;  %2021 = vrot.lane.b32.xlu1 %v4828_v47, %s3708_s14 }
 0x658   :  { %1953 = vrot.lane.b32.xlu0 %v4828_v47, %s3710_s16 }
 0x65f   :  { %1987 = vrot.lane.b32.xlu2 %v4828_v47, %s3709_s15  ;;  %2159 = vrot.lane.b32.xlu1 %v4837_v9, %s3705_s3 }
 0x660   :  { %2125 = vrot.lane.b32.xlu0 %v4837_v9, %s3706_s12 }
 0x667   :  { %2193 = vrot.lane.b32.xlu2 %v4837_v9, %s3704_s2  ;;  %2195 = vrot.lane.b32.xlu1 %v1919_v43, %s3704_s2 }
 0x668   :  { %2057 = vrot.lane.b32.xlu0 %v4837_v9, %s3700_s22 }
 0x66f   :  { %2091 = vrot.lane.b32.xlu2 %v4837_v9, %s3707_s13  ;;  %2023 = vrot.lane.b32.xlu1 %v4837_v9, %s3708_s14 }
 0x670   :  { %2127 = vrot.lane.b32.xlu0 %v1919_v43, %s3706_s12 }
 0x677   :  { %2161 = vrot.lane.b32.xlu2 %v1919_v43, %s3705_s3  ;;  %2093 = vrot.lane.b32.xlu1 %v1919_v43, %s3707_s13 }
 0x678   :  { %1955 = vrot.lane.b32.xlu0 %v4837_v9, %s3710_s16 }
 0x67f   :  { %1989 = vrot.lane.b32.xlu2 %v4837_v9, %s3709_s15  ;;  %2025 = vrot.lane.b32.xlu1 %v1919_v43, %s3708_s14 }
 0x680   :  { %1991 = vrot.lane.b32.xlu0 %v1919_v43, %s3709_s15 }
 0x687   :  { %2059 = vrot.lane.b32.xlu2 %v1919_v43, %s3700_s22  ;;  %2197 = vrot.lane.b32.xlu1 %v2183_v40, %s3704_s2  ;;  %s3583_s2 = sshll.u32 %s5828_s9, 4  ;;  %s3584_s2 = int_to_ptr.hbm [resolvable:$true] %s3583_s2 }
 0x688   :  { %2163 = vrot.lane.b32.xlu0 %v2183_v40, %s3705_s3 }
 0x68f   :  { %2095 = vrot.lane.b32.xlu1 %v2183_v40, %s3707_s13  ;;  %1957 = vrot.lane.b32.xlu2 %v1919_v43, %s3710_s16 }
 0x690   :  { %2061 = vrot.lane.b32.xlu0 %v2183_v40, %s3700_s22 }
 0x691   :  { %v2156_v37 = vpop.permute.xlu2 %2155 }
 0x697   :  { %1993 = vrot.lane.b32.xlu1 %v2183_v40, %s3709_s15  ;;  %2129 = vrot.lane.b32.xlu2 %v2183_v40, %s3706_s12 }
 0x698   :  { %1959 = vrot.lane.b32.xlu0 %v2183_v40, %s3710_s16 }
 0x699   :  { %v2122_v28 = vpop.permute.xlu2 %2121 }
 0x69f   :  { %2027 = vrot.lane.b32.xlu2 %v2183_v40, %s3708_s14 }
 0x6a1   :  { %v4903_v4 = vpop.permute.xlu2 %2019 }
 0x6a7   :  { %2262 = vperm.xlu2 %3610, %v2259_v55  }
 0x6a9   :  { %v2190_v24 = vpop.permute.xlu1 %2189  ;;  %v2192_v54 = vpop.permute.xlu2 %2191 }
 0x6aa   :  { %v2088_v51 = vpop.permute.xlu0 %2087  ;;  %v2199_v45 = vsel %vm507_vm9, %v2190_v24, %v2192_v54 }
 0x6ab   :  { %v4909_v33 = vand.u32 4294901760, %v2199_v45 }
 0x6ad   :  { %2276 = vmatpush.msrb.mxu2 %v4909_v33  ;;  %2416 = vmatpush.msra.mxu1 %v4909_v33  ;;  %v4914_v3 = vsub.f32 %v2199_v45, %v4909_v33  ;;  %v2296_v45 = vsub.f32 %v4975_v58, %v5006_v12 }
 0x6af   :  { %2377 = vmatpush.msra.mxu0 %v4914_v3  ;;  %v2311_v34 = vand.u32 4294901760, %v4914_v3 }
 0x6b1   :  { %v2054_v15 = vpop.permute.xlu1 %2053  ;;  %v2090_v1 = vpop.permute.xlu2 %2089  ;;  %v2312_v50 = vsub.f32 %v4914_v3, %v2311_v34 }
 0x6b2   :  { %v1986_v5 = vpop.permute.xlu0 %1985  ;;  %v2097_v30 = vsel %vm402_vm12, %v2088_v51, %v2090_v1 }
 0x6b3   :  { %v2313_v23 = vand.u32 4294901760, %v2312_v50  ;;  %v4932_v42 = vand.u32 4294901760, %v2097_v30 }
 0x6b5   :  { %2314 = vmatpush.msrb.mxu3 %v2313_v23  ;;  %v4947_v48 = vsub.f32 %v2097_v30, %v4932_v42 }
 0x6b7   :  { %v2329_v52 = vand.u32 4294901760, %v4947_v48 }
 0x6b9   :  { %v1952_v41 = vpop.permute.xlu1 %1951  ;;  %v4922_v21 = vpop.permute.xlu2 %1987  ;;  %v2330_v44 = vsub.f32 %v4947_v48, %v2329_v52 }
 0x6ba   :  { %v4924_v14 = vpop.permute.xlu0 %2157  ;;  %v1995_v11 = vsel %vm298_vm15, %v1986_v5, %v4922_v21 }
 0x6bb   :  { %v2165_v31 = vsel %vm472_vm10, %v2156_v37, %v4924_v14  ;;  %v4980_v53 = vand.u32 4294901760, %v1995_v11 }
 0x6bc   :  { %v4930_v35 = vand.u32 4294901760, %v2165_v31 }
 0x6bd   :  { %v5017_v46 = vsub.f32 %v1995_v11, %v4980_v53 }
 0x6be   :  { %2278 = vmatpush.msrb.mxu2 %v4930_v35  ;;  %2418 = vmatpush.msra.mxu1 %v4930_v35  ;;  %v4937_v59 = vsub.f32 %v2165_v31, %v4930_v35  ;;  %v5057_v31 = vand.u32 4294901760, %v2296_v45 }
 0x6bf   :  { %v2347_v50 = vand.u32 4294901760, %v5017_v46 }
 0x6c0   :  { %2380 = vmatpush.msra.mxu0 %v4937_v59  ;;  %v2317_v25 = vand.u32 4294901760, %v4937_v59 }
 0x6c1   :  { %v4942_v60 = vpop.permute.xlu1 %2123  ;;  %v4944_v38 = vpop.permute.xlu2 %2193 }
 0x6c2   :  { %v2131_v13 = vsel %vm437_vm11, %v2122_v28, %v4942_v60  ;;  %v4953_v27 = vpop.permute.xlu0 %2055  ;;  %v2200_v26 = vsel %vm507_vm9, %v2192_v54, %v4944_v38  ;;  %v2318_v63 = vsub.f32 %v4937_v59, %v2317_v25  ;;  %v2331_v54 = vand.u32 4294901760, %v2330_v44 }
 0x6c3   :  { %v2063_v32 = vsel %vm86_vm0, %v2054_v15, %v4953_v27  ;;  %v4962_v18 = vand.u32 4294901760, %v2131_v13  ;;  %v4964_v0 = vand.u32 4294901760, %v2200_v26 }
 0x6c4   :  { %v2319_v49 = vand.u32 4294901760, %v2318_v63  ;;  %v4966_v56 = vand.u32 4294901760, %v2063_v32 }
 0x6c5   :  { %2280 = vmatpush.msrb.mxu2 %v4962_v18  ;;  %2420 = vmatpush.msra.mxu1 %v4962_v18  ;;  %v4971_v36 = vsub.f32 %v2131_v13, %v4962_v18  ;;  %v4983_v62 = vsub.f32 %v2200_v26, %v4964_v0 }
 0x6c6   :  { %2320 = vmatpush.msrb.mxu3 %v2319_v49  ;;  %v4978_v61 = vsub.f32 %v2063_v32, %v4966_v56  ;;  %v2348_v32 = vsub.f32 %v5017_v46, %v2347_v50 }
 0x6c7   :  { %2282 = vmatpush.msrb.mxu2 %v4932_v42  ;;  %2383 = vmatpush.msra.mxu0 %v4971_v36  ;;  %v2323_v2 = vand.u32 4294901760, %v4971_v36  ;;  %v2561_v40 = vand.u32 4294901760, %v4983_v62 }
 0x6c8   :  { %2422 = vmatpush.msra.mxu1 %v4932_v42  ;;  %v2335_v17 = vand.u32 4294901760, %v4978_v61 }
 0x6c9   :  { %v4990_v6 = vpop.permute.xlu1 %2021  ;;  %v4992_v10 = vpop.permute.xlu2 %2091  ;;  %2284 = vmatpush.msrb.mxu2 %v4966_v56  ;;  %2386 = vmatpush.msra.mxu0 %v4947_v48  ;;  %v2324_v39 = vsub.f32 %v4971_v36, %v2323_v2  ;;  %v2562_v30 = vsub.f32 %v4983_v62, %v2561_v40 }
 0x6ca   :  { %v2029_v57 = vsel %vm333_vm13, %v4903_v4, %v4990_v6  ;;  %v5011_v43 = vpop.permute.xlu0 %1953  ;;  %v2098_v20 = vsel %vm402_vm12, %v2090_v1, %v4992_v10  ;;  %2424 = vmatpush.msra.mxu1 %v4966_v56  ;;  %v2336_v55 = vsub.f32 %v4978_v61, %v2335_v17  ;;  %v5042_v1 = vsub.f32 %v4825_v7, %v5003_v8 }
 0x6cb   :  { %v1961_v37 = vsel %vm263_vm3, %v1952_v41, %v5011_v43  ;;  %2389 = vmatpush.msra.mxu0 %v4978_v61  ;;  %v5023_v28 = vand.u32 4294901760, %v2029_v57  ;;  %v2325_v4 = vand.u32 4294901760, %v2324_v39  ;;  %v5052_v41 = vand.u32 4294901760, %v2098_v20 }
 0x6cc   :  { %v5028_v24 = vand.u32 4294901760, %v1961_v37  ;;  %v2337_v5 = vand.u32 4294901760, %v2336_v55  ;;  %v2359_v49 = vand.u32 4294901760, %v5042_v1  ;;  %v2563_v39 = vand.u32 4294901760, %v2562_v30 }
 0x6cd   :  { %2286 = vmatpush.msrb.mxu2 %v5023_v28  ;;  %2326 = vmatpush.msrb.mxu3 %v2325_v4  ;;  %v5032_v51 = vsub.f32 %v2029_v57, %v5023_v28  ;;  %v5088_v4 = vsub.f32 %v2098_v20, %v5052_v41  ;;  %v2349_v20 = vand.u32 4294901760, %v2348_v32 }
 0x6ce   :  { %2426 = vmatpush.msra.mxu1 %v5023_v28  ;;  %v5038_v15 = vsub.f32 %v1961_v37, %v5028_v24  ;;  %v2360_v45 = vsub.f32 %v5042_v1, %v2359_v49 }
 0x6cf   :  { %2288 = vmatpush.msrb.mxu2 %v4980_v53  ;;  %2332 = vmatpush.msrb.mxu3 %v2331_v54  ;;  %v2341_v23 = vand.u32 4294901760, %v5032_v51 }
 0x6d0   :  { %2392 = vmatpush.msra.mxu0 %v5032_v51  ;;  %2428 = vmatpush.msra.mxu1 %v4980_v53  ;;  %v2353_v22 = vand.u32 4294901760, %v5038_v15 }
 0x6d1   :  { %v2160_v7 = vpop.permute.xlu1 %2159  ;;  %v5054_v11 = vpop.permute.xlu2 %2161  ;;  %2290 = vmatpush.msrb.mxu2 %v5028_v24  ;;  %2338 = vmatpush.msrb.mxu3 %v2337_v5  ;;  %v2342_v29 = vsub.f32 %v5032_v51, %v2341_v23 }
 0x6d2   :  { %v2166_v13 = vsel %vm472_vm10, %v4924_v14, %v2160_v7  ;;  %v5065_v26 = vpop.permute.xlu0 %2125  ;;  %v5069_v63 = vsel %vm472_vm10, %v2160_v7, %v5054_v11  ;;  %2395 = vmatpush.msra.mxu0 %v5017_v46  ;;  %2430 = vmatpush.msra.mxu1 %v5028_v24 }
 0x6d3   :  { %v2132_v14 = vsel %vm437_vm11, %v4942_v60, %v5065_v26  ;;  %2292 = vmatpush.msrb.mxu2 %v5003_v8  ;;  %v2343_v44 = vand.u32 4294901760, %v2342_v29  ;;  %v5081_v57 = vand.u32 4294901760, %v2166_v13  ;;  %v2354_v60 = vsub.f32 %v5038_v15, %v2353_v22 }
 0x6d4   :  { %2398 = vmatpush.msra.mxu0 %v5038_v15  ;;  %2432 = vmatpush.msra.mxu1 %v5003_v8  ;;  %v5085_v37 = vand.u32 4294901760, %v2132_v14 }
 0x6d5   :  { %2298 = vmatmul.f32.vlgmr.msrb.gmra.mxu2 %v5057_v31  ;;  %v5095_v55 = vsub.f32 %v2166_v13, %v5081_v57  ;;  %2344 = vmatpush.msrb.mxu3 %v2343_v44  ;;  %v2355_v29 = vand.u32 4294901760, %v2354_v60  ;;  %v2361_v44 = vand.u32 4294901760, %v2360_v45 }
 0x6d6   :  { %2564 = vmatpush.msrb.mxu1 %v2563_v39  ;;  %2450 = vmatpush.msra.mxu2 %v2311_v34  ;;  %v5100_v54 = vsub.f32 %v2132_v14, %v5085_v37  ;;  %v2579_v34 = vand.u32 4294901760, %v5088_v4 }
 0x6d7   :  { %2401 = vmatpush.msra.mxu0 %v5042_v1  ;;  %v2567_v5 = vand.u32 4294901760, %v5095_v55  ;;  %2436 = vmatmul.f32.vlgmr.msra.gmra.mxu1 %v5006_v12 }
 0x6d8   :  { %2454 = vmatpush.msra.mxu2 %v2317_v25  ;;  %v2573_v3 = vand.u32 4294901760, %v5100_v54  ;;  %2350 = vmatpush.msrb.mxu3 %v2349_v20  ;;  %v2580_v36 = vsub.f32 %v5088_v4, %v2579_v34 }
 0x6d9   :  { %2526 = vmatpush.msrb.mxu0 %v4964_v0  ;;  %v5113_v30 = vpop.permute.xlu1 %2195  ;;  %v5115_v7 = vpop.permute.xlu2 %1989  ;;  %v2568_v13 = vsub.f32 %v5095_v55, %v2567_v5 }
 0x6da   :  { %2404 = vmatmul.f32.vlgmr.msra.gmra.mxu0 %v4975_v58  ;;  %v2058_v59 = vpop.permute.xlu0 %2057  ;;  %v5124_v25 = vsel %vm507_vm9, %v4944_v38, %v5113_v30  ;;  %v1996_v32 = vsel %vm298_vm15, %v4922_v21, %v5115_v7  ;;  %2458 = vmatpush.msra.mxu2 %v2323_v2  ;;  %v2574_v14 = vsub.f32 %v5100_v54, %v2573_v3 }
 0x6db   :  { %2528 = vmatpush.msrb.mxu0 %v5081_v57  ;;  %v2064_v39 = vsel %vm86_vm0, %v4953_v27, %v2058_v59  ;;  %2356 = vmatpush.msrb.mxu3 %v2355_v29  ;;  %v2569_v38 = vand.u32 4294901760, %v2568_v13  ;;  %v5145_v2 = vand.u32 4294901760, %v1996_v32 }
 0x6dc   :  { %2462 = vmatpush.msra.mxu2 %v2329_v52  ;;  %v5140_v21 = vand.u32 4294901760, %v2064_v39  ;;  %v2575_v27 = vand.u32 4294901760, %v2574_v14  ;;  %v2581_v52 = vand.u32 4294901760, %v2580_v36 }
 0x6dd   :  { %2530 = vmatpush.msrb.mxu0 %v5085_v37  ;;  %2362 = vmatpush.msrb.mxu3 %v2361_v44  ;;  %v5163_v61 = vsub.f32 %v1996_v32, %v5145_v2  ;;  %v5246_v44 = vand.u32 4294901760, %v5124_v25 }
 0x6de   :  { %2570 = vmatpush.msrb.mxu1 %v2569_v38  ;;  %2364 = vmatmul.f32.vlgmr.msrb.gmra.mxu3 %v4949_v16  ;;  %v5151_v48 = vsub.f32 %v2064_v39, %v5140_v21 }
 0x6df   :  { %2466 = vmatpush.msra.mxu2 %v2335_v17  ;;  %2496 = vmatpush.msra.mxu3 %v4909_v33 }
 0x6e0   :  { %2532 = vmatpush.msrb.mxu0 %v5052_v41  ;;  %2576 = vmatpush.msrb.mxu1 %v2575_v27  ;;  %v2585_v60 = vand.u32 4294901760, %v5151_v48 }
 0x6e1   :  { %2470 = vmatpush.msra.mxu2 %v2341_v23  ;;  %v2024_v20 = vpop.permute.xlu1 %2023  ;;  %v5158_v45 = vpop.permute.xlu2 %2059  ;;  %2498 = vmatpush.msra.mxu3 %v4930_v35 }
 0x6e2   :  { %2534 = vmatpush.msrb.mxu0 %v5140_v21  ;;  %v2030_v33 = vsel %vm333_vm13, %v4990_v6, %v2024_v20  ;;  %v2128_v17 = vpop.permute.xlu0 %2127  ;;  %v5169_v51 = vsel %vm86_vm0, %v2058_v59, %v5158_v45  ;;  %2582 = vmatpush.msrb.mxu1 %v2581_v52  ;;  %v2586_v35 = vsub.f32 %v5151_v48, %v2585_v60 }
 0x6e3   :  { %2474 = vmatpush.msra.mxu2 %v2347_v50  ;;  %v5178_v23 = vsel %vm437_vm11, %v5065_v26, %v2128_v17  ;;  %2500 = vmatpush.msra.mxu3 %v4962_v18  ;;  %v5181_v6 = vand.u32 4294901760, %v2030_v33  ;;  %v5191_v50 = vand.u32 4294901760, %v4828_v47  ;;  %v2597_v26 = vand.u32 4294901760, %v5163_v61 }
 0x6e4   :  { %v2587_v29 = vand.u32 4294901760, %v2586_v35 }
 0x6e5   :  { %2478 = vmatpush.msra.mxu2 %v2353_v22  ;;  %2502 = vmatpush.msra.mxu3 %v4932_v42  ;;  %v5188_v46 = vsub.f32 %v2030_v33, %v5181_v6  ;;  %v5214_v22 = vsub.f32 %v4828_v47, %v5191_v50 }
 0x6e6   :  { %2536 = vmatpush.msrb.mxu0 %v5181_v6  ;;  %2588 = vmatpush.msrb.mxu1 %v2587_v29 }
 0x6e7   :  { %2482 = vmatpush.msra.mxu2 %v2359_v49  ;;  %2504 = vmatpush.msra.mxu3 %v4966_v56  ;;  %v2591_v42 = vand.u32 4294901760, %v5188_v46  ;;  %v2598_v56 = vsub.f32 %v5163_v61, %v2597_v26  ;;  %v2609_v14 = vand.u32 4294901760, %v5214_v22 }
 0x6e8   :  { %2484 = vmatmul.f32.vlgmr.msra.gmra.mxu2 %v4949_v16  ;;  %2538 = vmatpush.msrb.mxu0 %v5145_v2 }
 0x6e9   :  { %2627 = vmatpush.msrb.mxu2 %v4983_v62  ;;  %v5201_v18 = vpop.permute.xlu1 %2093  ;;  %v5203_v15 = vpop.permute.xlu2 %1957  ;;  %2506 = vmatpush.msra.mxu3 %v5023_v28  ;;  %v2592_v1 = vsub.f32 %v5188_v46, %v2591_v42 }
 0x6ea   :  { %v1956_v49 = vpop.permute.xlu0 %1955  ;;  %v5219_v13 = vsel %vm402_vm12, %v4992_v10, %v5201_v18  ;;  %v2599_v10 = vand.u32 4294901760, %v2598_v56 }
 0x6eb   :  { %2630 = vmatpush.msrb.mxu2 %v5095_v55  ;;  %v1962_v28 = vsel %vm263_vm3, %v5011_v43, %v1956_v49  ;;  %v5226_v59 = vsel %vm263_vm3, %v1956_v49, %v5203_v15  ;;  %2508 = vmatpush.msra.mxu3 %v4980_v53  ;;  %v2593_v32 = vand.u32 4294901760, %v2592_v1  ;;  %v5293_v55 = vand.u32 4294901760, %v5219_v13 }
 0x6ec   :  { %v5230_v47 = vand.u32 4294901760, %v1962_v28 }
 0x6ed   :  { %2633 = vmatpush.msrb.mxu2 %v5100_v54  ;;  %2510 = vmatpush.msra.mxu3 %v5028_v24 }
 0x6ee   :  { %2594 = vmatpush.msrb.mxu1 %v2593_v32  ;;  %2540 = vmatpush.msrb.mxu0 %v5230_v47  ;;  %v5237_v43 = vsub.f32 %v1962_v28, %v5230_v47 }
 0x6ef   :  { %2636 = vmatpush.msrb.mxu2 %v5088_v4  ;;  %2512 = vmatpush.msra.mxu3 %v5003_v8  ;;  %v2610_v8 = vsub.f32 %v5214_v22, %v2609_v14 }
 0x6f0   :  { %2600 = vmatpush.msrb.mxu1 %v2599_v10  ;;  %2514 = vmatmul.f32.vlgmr.msra.gmra.mxu3 %v4949_v16  ;;  %v2603_v53 = vand.u32 4294901760, %v5237_v43 }
 0x6f1   :  { %2639 = vmatpush.msrb.mxu2 %v5151_v48  ;;  %v2026_v24 = vpop.permute.xlu1 %2025  ;;  %v2130_v39 = vpop.permute.xlu2 %2129  ;;  %2666 = vmatpush.msrb.mxu3 %v4964_v0  ;;  %v2611_v62 = vand.u32 4294901760, %v2610_v8 }
 0x6f2   :  { %2542 = vmatpush.msrb.mxu0 %v5191_v50  ;;  %v5252_v38 = vsel %vm333_vm13, %v2024_v20, %v2026_v24  ;;  %v5254_v36 = vpop.permute.xlu0 %1991  ;;  %v5257_v27 = vsel %vm437_vm11, %v2128_v17, %v2130_v39  ;;  %2144 = vst.msk [vmem:[#allocation3 + $0x110] sm:$0xff] %vm99_vm1, %v2130_v39  ;;  %v2604_v52 = vsub.f32 %v5237_v43, %v2603_v53  ;;  %v5275_v17 = vand.u32 4294901760, %v5069_v63 }
 0x6f3   :  { %2642 = vmatpush.msrb.mxu2 %v5188_v46  ;;  %2548 = vmatmul.f32.vlgmr.msrb.gmra.mxu0 %v5057_v31  ;;  %v5268_v20 = vsel %vm298_vm15, %v5115_v7, %v5254_v36  ;;  %v5283_v7 = vsub.f32 %v5124_v25, %v5246_v44 }
 0x6f4   :  { %2668 = vmatpush.msrb.mxu3 %v5081_v57  ;;  %2700 = vmatpush.msra.mxu0 %v2561_v40  ;;  %v2605_v33 = vand.u32 4294901760, %v2604_v52  ;;  %v5286_v40 = vand.u32 4294901760, %v5178_v23 }
 0x6f5   :  { %2645 = vmatpush.msrb.mxu2 %v5163_v61  ;;  %v2811_v29 = vand.u32 4294901760, %v5283_v7 }
 0x6f6   :  { %2670 = vmatpush.msrb.mxu3 %v5085_v37  ;;  %2704 = vmatpush.msra.mxu0 %v2567_v5  ;;  %v5297_v5 = vsub.f32 %v5069_v63, %v5275_v17  ;;  %v5310_v63 = vand.u32 4294901760, %v5169_v51  ;;  %v5315_v1 = vsub.f32 %v5178_v23, %v5286_v40  ;;  %v5355_v23 = vand.u32 4294901760, %v5268_v20 }
 0x6f7   :  { %2648 = vmatpush.msrb.mxu2 %v5237_v43  ;;  %2606 = vmatpush.msrb.mxu1 %v2605_v33 }
 0x6f8   :  { %2672 = vmatpush.msrb.mxu3 %v5052_v41  ;;  %2708 = vmatpush.msra.mxu0 %v2573_v3  ;;  %v2817_v4 = vand.u32 4294901760, %v5297_v5  ;;  %v2823_v48 = vand.u32 4294901760, %v5315_v1  ;;  %v5396_v10 = vsub.f32 %v5268_v20, %v5355_v23 }
 0x6f9   :  { %2651 = vmatpush.msrb.mxu2 %v5214_v22  ;;  %2612 = vmatpush.msrb.mxu1 %v2611_v62  ;;  %v2198_v25 = vpop.permute.xlu1 %2197  ;;  %v2028_v35 = vpop.permute.xlu2 %2027 }
 0x6fa   :  { %2674 = vmatpush.msrb.mxu3 %v5140_v21  ;;  %2654 = vmatmul.f32.vlgmr.msrb.gmra.mxu2 %v4975_v58  ;;  %v5303_v54 = vsel %vm507_vm9, %v5113_v30, %v2198_v25  ;;  %2212 = vst.msk [vmem:[#allocation3 + $0x160] sm:$0xff] %vm99_vm1, %v2198_v25  ;;  %v2164_v3 = vpop.permute.xlu0 %2163  ;;  %v5322_v56 = vsel %vm333_vm13, %v2026_v24, %v2028_v35 }
 0x6fb   :  { %2712 = vmatpush.msra.mxu0 %v2579_v34  ;;  %2776 = vmatpush.msra.mxu2 %v5246_v44  ;;  %v5319_v30 = vsel %vm472_vm10, %v5054_v11, %v2164_v3  ;;  %v5332_v34 = vsub.f32 %v5219_v13, %v5293_v55  ;;  %2178 = vst.msk [vmem:[#allocation3 + $0x138] sm:$0xff] %vm99_vm1, %v2164_v3  ;;  %v5338_v11 = vand.u32 4294901760, %v5252_v38 }
 0x6fc   :  { %2676 = vmatpush.msrb.mxu3 %v5181_v6  ;;  %2614 = vmatmul.f32.vlgmr.msrb.gmra.mxu1 %v4949_v16  ;;  %2042 = vst.msk [vmem:[#allocation3 + $0x98] sm:$0xff] %vm99_vm1, %v2028_v35  ;;  %v2824_v13 = vsub.f32 %v5315_v1, %v2823_v48  ;;  %v5480_v35 = vand.u32 4294901760, %v5257_v27 }
 0x6fd   :  { %2716 = vmatpush.msra.mxu0 %v2585_v60  ;;  %2746 = vmatpush.msra.mxu1 %v4964_v0  ;;  %v2812_v0 = vsub.f32 %v5283_v7, %v2811_v29  ;;  %v5349_v60 = vsub.f32 %v5169_v51, %v5310_v63  ;;  %v2829_v51 = vand.u32 4294901760, %v5332_v34  ;;  %v5371_v61 = vsub.f32 %v5252_v38, %v5338_v11 }
 0x6fe   :  { %2778 = vmatpush.msra.mxu2 %v5275_v17  ;;  %2678 = vmatpush.msrb.mxu3 %v5145_v2  ;;  %v2825_v22 = vand.u32 4294901760, %v2824_v13 }
 0x6ff   :  { %2720 = vmatpush.msra.mxu0 %v2591_v42  ;;  %2748 = vmatpush.msra.mxu1 %v5081_v57  ;;  %v2818_v57 = vsub.f32 %v5297_v5, %v2817_v4  ;;  %v5367_v42 = vand.u32 4294901760, %v5226_v59  ;;  %v2813_v49 = vand.u32 4294901760, %v2812_v0  ;;  %v2835_v28 = vand.u32 4294901760, %v5349_v60 }
 0x700   :  { %2780 = vmatpush.msra.mxu2 %v5286_v40  ;;  %2680 = vmatpush.msrb.mxu3 %v5230_v47 }
 0x701   :  { %2724 = vmatpush.msra.mxu0 %v2597_v26  ;;  %2750 = vmatpush.msra.mxu1 %v5085_v37  ;;  %v2096_v46 = vpop.permute.xlu1 %2095  ;;  %v2819_v43 = vand.u32 4294901760, %v2818_v57 }
 0x702   :  { %2782 = vmatpush.msra.mxu2 %v5293_v55  ;;  %2682 = vmatpush.msrb.mxu3 %v5191_v50  ;;  %v5375_v37 = vsel %vm402_vm12, %v5201_v18, %v2096_v46  ;;  %2110 = vst.msk [vmem:[#allocation3 + $0xe8] sm:$0xff] %vm99_vm1, %v2096_v46  ;;  %v2062_v26 = vpop.permute.xlu0 %2061  ;;  %v5392_v18 = vand.u32 4294901760, %v4837_v9 }
 0x703   :  { %2686 = vmatmul.f32.vlgmr.msrb.gmra.mxu3 %v5006_v12  ;;  %2728 = vmatpush.msra.mxu0 %v2603_v53  ;;  %v5387_v32 = vsel %vm86_vm0, %v5158_v45, %v2062_v26  ;;  %v2830_v45 = vsub.f32 %v5332_v34, %v2829_v51  ;;  %2076 = vst.msk [vmem:[#allocation3 + $0xc0] sm:$0xff] %vm99_vm1, %v2062_v26  ;;  %v5572_v26 = vand.u32 4294901760, %v4858_v19 }
 0x704   :  { %2752 = vmatpush.msra.mxu1 %v5052_v41  ;;  %2784 = vmatpush.msra.mxu2 %v5310_v63  ;;  %v2841_v41 = vand.u32 4294901760, %v5371_v61  ;;  %v5409_v53 = vsub.f32 %v5226_v59, %v5367_v42  ;;  %v5420_v24 = vsub.f32 %v4837_v9, %v5392_v18 }
 0x705   :  { %2814 = vmatpush.msra.mxu3 %v2813_v49  ;;  %2732 = vmatpush.msra.mxu0 %v2609_v14  ;;  %v2836_v14 = vsub.f32 %v5349_v60, %v2835_v28  ;;  %v2831_v59 = vand.u32 4294901760, %v2830_v45 }
 0x706   :  { %2754 = vmatpush.msra.mxu1 %v5140_v21  ;;  %2786 = vmatpush.msra.mxu2 %v5338_v11  ;;  %v2847_v21 = vand.u32 4294901760, %v5396_v10  ;;  %v2853_v8 = vand.u32 4294901760, %v5409_v53  ;;  %v2859_v20 = vand.u32 4294901760, %v5420_v24 }
 0x707   :  { %2820 = vmatpush.msra.mxu3 %v2819_v43  ;;  %2877 = vmatpush.msrb.mxu0 %v5283_v7  ;;  %v2837_v52 = vand.u32 4294901760, %v2836_v14 }
 0x708   :  { %2756 = vmatpush.msra.mxu1 %v5181_v6  ;;  %2788 = vmatpush.msra.mxu2 %v5355_v23  ;;  %v2842_v6 = vsub.f32 %v5371_v61, %v2841_v41  ;;  %v2860_v62 = vsub.f32 %v5420_v24, %v2859_v20 }
 0x709   :  { %2826 = vmatpush.msra.mxu3 %v2825_v22  ;;  %2880 = vmatpush.msrb.mxu0 %v5297_v5  ;;  %v1994_v39 = vpop.permute.xlu1 %1993  ;;  %v5473_v5 = vand.u32 4294901760, %v5319_v30 }
 0x70a   :  { %2758 = vmatpush.msra.mxu1 %v5145_v2  ;;  %2790 = vmatpush.msra.mxu2 %v5367_v42  ;;  %v5431_v38 = vsel %vm298_vm15, %v5254_v36, %v1994_v39  ;;  %2008 = vst.msk [vmem:[#allocation3 + $0x70] sm:$0xff] %vm99_vm1, %v1994_v39  ;;  %v1960_v9 = vpop.permute.xlu0 %1959  ;;  %v2848_v36 = vsub.f32 %v5396_v10, %v2847_v21  ;;  %v2861_v25 = vand.u32 4294901760, %v2860_v62  ;;  %v2248_v39 = vld [vmem:[#allocation3 + $0x110] sm:$0xff] }
 0x70b   :  { %2832 = vmatpush.msra.mxu3 %v2831_v59  ;;  %2883 = vmatpush.msrb.mxu0 %v5315_v1  ;;  %v5437_v2 = vsel %vm263_vm3, %v5203_v15, %v1960_v9  ;;  %1974 = vst.msk [vmem:[#allocation3 + $0x48] sm:$0xff] %vm99_vm1, %v1960_v9  ;;  %v2843_v15 = vand.u32 4294901760, %v2842_v6  ;;  %v5506_v1 = vsub.f32 %v5257_v27, %v5480_v35  ;;  %v5521_v27 = vand.u32 4294901760, %v5322_v56  ;;  %v2243_v9 = vld [vmem:[#allocation3 + $0xe8] sm:$0xff] }
 0x70c   :  { %2734 = vmatmul.f32.vlgmr.msra.gmra.mxu0 %v4949_v16  ;;  %2760 = vmatpush.msra.mxu1 %v5230_v47  ;;  %v2854_v47 = vsub.f32 %v5409_v53, %v2853_v8  ;;  %v2849_v33 = vand.u32 4294901760, %v2848_v36  ;;  %v5536_v0 = vand.u32 4294901760, %v5431_v38  ;;  %v2238_v36 = vld [vmem:[#allocation3 + $0xc0] sm:$0xff] }
 0x70d   :  { %2792 = vmatpush.msra.mxu2 %v5392_v18  ;;  %2838 = vmatpush.msra.mxu3 %v2837_v52 }
 0x70e   :  { %2798 = vmatmul.f32.vlgmr.msra.gmra.mxu2 %v5057_v31  ;;  %2886 = vmatpush.msrb.mxu0 %v5332_v34  ;;  %v2855_v7 = vand.u32 4294901760, %v2854_v47  ;;  %v3073_v34 = vand.u32 4294901760, %v5506_v1 }
 0x70f   :  { %2950 = vmatpush.msrb.mxu2 %v2811_v29  ;;  %2762 = vmatpush.msra.mxu1 %v5191_v50  ;;  %v5466_v50 = vand.u32 4294901760, %v5303_v54  ;;  %v5493_v29 = vsub.f32 %v5319_v30, %v5473_v5  ;;  %v5512_v30 = vand.u32 4294901760, %v5387_v32 }
 0x710   :  { %2844 = vmatpush.msra.mxu3 %v2843_v15  ;;  %2764 = vmatmul.f32.vlgmr.msra.gmra.mxu1 %v4949_v16  ;;  %v3074_v46 = vsub.f32 %v5506_v1, %v3073_v34  ;;  %v5641_v15 = vand.u32 4294901760, %v2243_v9 }
 0x711   :  { %2889 = vmatpush.msrb.mxu0 %v5349_v60  ;;  %2916 = vmatpush.msrb.mxu1 %v5246_v44  ;;  %v5484_v3 = vsub.f32 %v5303_v54, %v5466_v50  ;;  %v5499_v54 = vand.u32 4294901760, %v5375_v37  ;;  %v5551_v60 = vand.u32 4294901760, %v5437_v2 }
 0x712   :  { %2954 = vmatpush.msrb.mxu2 %v2817_v4  ;;  %2850 = vmatpush.msra.mxu3 %v2849_v33  ;;  %v5650_v33 = vand.u32 4294901760, %v2238_v36 }
 0x713   :  { %2892 = vmatpush.msrb.mxu0 %v5371_v61  ;;  %2918 = vmatpush.msrb.mxu1 %v5275_v17  ;;  %v5525_v4 = vsub.f32 %v5375_v37, %v5499_v54  ;;  %v5568_v37 = vsub.f32 %v5431_v38, %v5536_v0  ;;  %v5582_v13 = vsub.f32 %v5437_v2, %v5551_v60  ;;  %v5635_v2 = vand.u32 4294901760, %v2248_v39 }
 0x714   :  { %2958 = vmatpush.msrb.mxu2 %v2823_v48  ;;  %2856 = vmatpush.msra.mxu3 %v2855_v7  ;;  %v5540_v48 = vsub.f32 %v5387_v32, %v5512_v30  ;;  %v2233_v7 = vld [vmem:[#allocation3 + $0x98] sm:$0xff] }
 0x715   :  { %2895 = vmatpush.msrb.mxu0 %v5396_v10  ;;  %2920 = vmatpush.msrb.mxu1 %v5286_v40  ;;  %v3079_v57 = vand.u32 4294901760, %v5525_v4  ;;  %v3097_v32 = vand.u32 4294901760, %v5568_v37  ;;  %v5594_v10 = vsub.f32 %v4858_v19, %v5572_v26  ;;  %v3103_v45 = vand.u32 4294901760, %v5582_v13 }
 0x716   :  { %2962 = vmatpush.msrb.mxu2 %v2829_v51  ;;  %2862 = vmatpush.msra.mxu3 %v2861_v25  ;;  %v5556_v51 = vsub.f32 %v5322_v56, %v5521_v27  ;;  %v3085_v61 = vand.u32 4294901760, %v5540_v48  ;;  %v5654_v25 = vsub.f32 %v2248_v39, %v5635_v2 }
 0x717   :  { %2864 = vmatmul.f32.vlgmr.msra.gmra.mxu3 %v4949_v16  ;;  %2898 = vmatpush.msrb.mxu0 %v5409_v53  ;;  %v3109_v53 = vand.u32 4294901760, %v5594_v10  ;;  %v3104_v14 = vsub.f32 %v5582_v13, %v3103_v45 }
 0x718   :  { %2922 = vmatpush.msrb.mxu1 %v5293_v55  ;;  %2966 = vmatpush.msrb.mxu2 %v2835_v28  ;;  %v3091_v49 = vand.u32 4294901760, %v5556_v51  ;;  %v3075_v28 = vand.u32 4294901760, %v3074_v46 }
 0x719   :  { %2996 = vmatpush.msrb.mxu3 %v5246_v44  ;;  %2901 = vmatpush.msrb.mxu0 %v5420_v24  ;;  %v3061_v44 = vand.u32 4294901760, %v5484_v3  ;;  %v3110_v6 = vsub.f32 %v5594_v10, %v3109_v53  ;;  %v3105_v38 = vand.u32 4294901760, %v3104_v14 }
 0x71a   :  { %2924 = vmatpush.msrb.mxu1 %v5310_v63  ;;  %2970 = vmatpush.msrb.mxu2 %v2841_v41  ;;  %v3098_v41 = vsub.f32 %v5568_v37, %v3097_v32 }
 0x71b   :  { %2998 = vmatpush.msrb.mxu3 %v5275_v17  ;;  %3026 = vmatpush.msra.mxu0 %v5466_v50  ;;  %v3067_v17 = vand.u32 4294901760, %v5493_v29 }
 0x71c   :  { %2926 = vmatpush.msrb.mxu1 %v5338_v11  ;;  %2974 = vmatpush.msrb.mxu2 %v2847_v21  ;;  %v2253_v21 = vld [vmem:[#allocation3 + $0x138] sm:$0xff]  ;;  %v3099_v59 = vand.u32 4294901760, %v3098_v41 }
 0x71d   :  { %3000 = vmatpush.msrb.mxu3 %v5286_v40  ;;  %3028 = vmatpush.msra.mxu0 %v5473_v5  ;;  %v3062_v40 = vsub.f32 %v5484_v3, %v3061_v44 }
 0x71e   :  { %2928 = vmatpush.msrb.mxu1 %v5355_v23  ;;  %2978 = vmatpush.msrb.mxu2 %v2853_v8  ;;  %v5626_v8 = vand.u32 4294901760, %v2253_v21 }
 0x71f   :  { %3002 = vmatpush.msrb.mxu3 %v5293_v55  ;;  %3030 = vmatpush.msra.mxu0 %v5480_v35  ;;  %v3068_v55 = vsub.f32 %v5493_v29, %v3067_v17 }
 0x720   :  { %2904 = vmatmul.f32.vlgmr.msrb.gmra.mxu0 %v4975_v58  ;;  %2930 = vmatpush.msrb.mxu1 %v5367_v42  ;;  %v5644_v47 = vsub.f32 %v2253_v21, %v5626_v8 }
 0x721   :  { %2982 = vmatpush.msrb.mxu2 %v2859_v20  ;;  %3004 = vmatpush.msrb.mxu3 %v5310_v63  ;;  %v3063_v63 = vand.u32 4294901760, %v3062_v40  ;;  %v3069_v56 = vand.u32 4294901760, %v3068_v55  ;;  %v3111_v20 = vand.u32 4294901760, %v3110_v6  ;;  %v5677_v40 = vsub.f32 %v2238_v36, %v5650_v33  ;;  %v2218_v55 = vld [vmem:[#allocation3 + $0x20] sm:$0xff] }
 0x722   :  { %2984 = vmatmul.f32.vlgmr.msrb.gmra.mxu2 %v4949_v16  ;;  %3032 = vmatpush.msra.mxu0 %v5499_v54 }
 0x723   :  { %3127 = vmatpush.msra.mxu2 %v5484_v3  ;;  %2932 = vmatpush.msrb.mxu1 %v5392_v18  ;;  %v3317_v3 = vand.u32 4294901760, %v5644_v47  ;;  %v3335_v46 = vand.u32 4294901760, %v5677_v40 }
 0x724   :  { %3006 = vmatpush.msrb.mxu3 %v5338_v11  ;;  %2936 = vmatmul.f32.vlgmr.msrb.gmra.mxu1 %v5006_v12  ;;  %v3080_v11 = vsub.f32 %v5525_v4, %v3079_v57 }
 0x725   :  { %3034 = vmatpush.msra.mxu0 %v5512_v30  ;;  %3064 = vmatpush.msra.mxu1 %v3063_v63 }
 0x726   :  { %3130 = vmatpush.msra.mxu2 %v5493_v29  ;;  %3008 = vmatpush.msrb.mxu3 %v5355_v23  ;;  %v3086_v23 = vsub.f32 %v5540_v48, %v3085_v61  ;;  %v3081_v43 = vand.u32 4294901760, %v3080_v11  ;;  %v2228_v29 = vld [vmem:[#allocation3 + $0x70] sm:$0xff] }
 0x727   :  { %3036 = vmatpush.msra.mxu0 %v5521_v27  ;;  %3070 = vmatpush.msra.mxu1 %v3069_v56 }
 0x728   :  { %3133 = vmatpush.msra.mxu2 %v5506_v1  ;;  %3010 = vmatpush.msrb.mxu3 %v5367_v42  ;;  %v3092_v42 = vsub.f32 %v5556_v51, %v3091_v49  ;;  %v3087_v19 = vand.u32 4294901760, %v3086_v23  ;;  %v5667_v1 = vand.u32 4294901760, %v2233_v7 }
 0x729   :  { %3038 = vmatpush.msra.mxu0 %v5536_v0  ;;  %3076 = vmatpush.msra.mxu1 %v3075_v28  ;;  %v3336_v28 = vsub.f32 %v5677_v40, %v3335_v46 }
 0x72a   :  { %3136 = vmatpush.msra.mxu2 %v5525_v4  ;;  %3012 = vmatpush.msrb.mxu3 %v5392_v18  ;;  %v2258_v18 = vld [vmem:[#allocation3 + $0x160] sm:$0xff]  ;;  %v3093_v22 = vand.u32 4294901760, %v3092_v42  ;;  %v2223_v4 = vld [vmem:[#allocation3 + $0x48] sm:$0xff] }
 0x72b   :  { %3014 = vmatmul.f32.vlgmr.msrb.gmra.mxu3 %v4949_v16  ;;  %3040 = vmatpush.msra.mxu0 %v5551_v60  ;;  %v5617_v24 = vand.u32 4294901760, %v2258_v18 }
 0x72c   :  { %3082 = vmatpush.msra.mxu1 %v3081_v43  ;;  %3139 = vmatpush.msra.mxu2 %v5540_v48 }
 0x72d   :  { %3166 = vmatpush.msra.mxu3 %v5466_v50  ;;  %3042 = vmatpush.msra.mxu0 %v5572_v26  ;;  %v5633_v52 = vsub.f32 %v2258_v18, %v5617_v24  ;;  %v2263_v18 = vpop.permute.xlu2 %2262 }
 0x72e   :  { %3088 = vmatpush.msra.mxu1 %v3087_v19  ;;  %3142 = vmatpush.msra.mxu2 %v5556_v51  ;;  %v5695_v51 = vsub.f32 %v2233_v7, %v5667_v1 }
 0x72f   :  { %3168 = vmatpush.msra.mxu3 %v5473_v5  ;;  %3048 = vmatmul.f32.vlgmr.msra.gmra.mxu0 %v5057_v31  ;;  %v3311_v62 = vand.u32 4294901760, %v5633_v52 }
 0x730   :  { %3200 = vmatpush.msrb.mxu0 %v3061_v44  ;;  %3094 = vmatpush.msra.mxu1 %v3093_v22  ;;  %v5663_v44 = vsub.f32 %v2243_v9, %v5641_v15 }
 0x731   :  { %3145 = vmatpush.msra.mxu2 %v5568_v37  ;;  %3170 = vmatpush.msra.mxu3 %v5480_v35 }
 0x732   :  { %3204 = vmatpush.msrb.mxu0 %v3067_v17  ;;  %3100 = vmatpush.msra.mxu1 %v3099_v59  ;;  %v3323_v17 = vand.u32 4294901760, %v5654_v25  ;;  %v3329_v48 = vand.u32 4294901760, %v5663_v44 }
 0x733   :  { %3148 = vmatpush.msra.mxu2 %v5582_v13  ;;  %3172 = vmatpush.msra.mxu3 %v5499_v54 }
 0x734   :  { %3208 = vmatpush.msrb.mxu0 %v3073_v34  ;;  %3106 = vmatpush.msra.mxu1 %v3105_v38  ;;  %v5681_v34 = vand.u32 4294901760, %v2228_v29  ;;  %v3324_v63 = vsub.f32 %v5654_v25, %v3323_v17  ;;  %v3330_v11 = vsub.f32 %v5663_v44, %v3329_v48 }
 0x735   :  { %3151 = vmatpush.msra.mxu2 %v5594_v10  ;;  %3174 = vmatpush.msra.mxu3 %v5512_v30 }
 0x736   :  { %3154 = vmatmul.f32.vlgmr.msra.gmra.mxu2 %v4975_v58  ;;  %3212 = vmatpush.msrb.mxu0 %v3079_v57  ;;  %v5692_v57 = vand.u32 4294901760, %v2223_v4  ;;  %v5709_v37 = vsub.f32 %v2228_v29, %v5681_v34  ;;  %v3325_v13 = vand.u32 4294901760, %v3324_v63 }
 0x737   :  { %3276 = vmatpush.msrb.mxu2 %v5617_v24  ;;  %3112 = vmatpush.msra.mxu1 %v3111_v20 }
 0x738   :  { %3176 = vmatpush.msra.mxu3 %v5521_v27  ;;  %3114 = vmatmul.f32.vlgmr.msra.gmra.mxu1 %v4949_v16 }
 0x739   :  { %3216 = vmatpush.msrb.mxu0 %v3085_v61  ;;  %3246 = vmatpush.msrb.mxu1 %v5466_v50  ;;  %v3312_v50 = vsub.f32 %v5633_v52, %v3311_v62  ;;  %v5706_v61 = vand.u32 4294901760, %v2218_v55 }
 0x73a   :  { %3278 = vmatpush.msrb.mxu2 %v5626_v8  ;;  %3178 = vmatpush.msra.mxu3 %v5536_v0 }
 0x73b   :  { %3220 = vmatpush.msrb.mxu0 %v3091_v49  ;;  %3248 = vmatpush.msrb.mxu1 %v5473_v5  ;;  %v3318_v5 = vsub.f32 %v5644_v47, %v3317_v3  ;;  %v5720_v49 = vsub.f32 %v2223_v4, %v5692_v57  ;;  %v3358_v23 = vsub.f32 %v2218_v55, %v5706_v61 }
 0x73c   :  { %3280 = vmatpush.msrb.mxu2 %v5635_v2  ;;  %3180 = vmatpush.msra.mxu3 %v5551_v60 }
 0x73d   :  { %3224 = vmatpush.msrb.mxu0 %v3097_v32  ;;  %3250 = vmatpush.msrb.mxu1 %v5480_v35  ;;  %v3313_v35 = vand.u32 4294901760, %v3312_v50  ;;  %v3319_v56 = vand.u32 4294901760, %v3318_v5  ;;  %v3331_v32 = vand.u32 4294901760, %v3330_v11  ;;  %v3353_v43 = vand.u32 4294901760, %v5720_v49 }
 0x73e   :  { %3282 = vmatpush.msrb.mxu2 %v5641_v15  ;;  %3182 = vmatpush.msra.mxu3 %v5572_v26 }
 0x73f   :  { %3186 = vmatmul.f32.vlgmr.msra.gmra.mxu3 %v5006_v12  ;;  %3228 = vmatpush.msrb.mxu0 %v3103_v45  ;;  %v3359_v45 = vand.u32 4294901760, %v3358_v23  ;;  %v3354_v19 = vsub.f32 %v5720_v49, %v3353_v43 }
 0x740   :  { %3252 = vmatpush.msrb.mxu1 %v5499_v54  ;;  %3284 = vmatpush.msrb.mxu2 %v5650_v33  ;;  %v3341_v54 = vand.u32 4294901760, %v5695_v51 }
 0x741   :  { %3314 = vmatpush.msrb.mxu3 %v3313_v35  ;;  %3232 = vmatpush.msrb.mxu0 %v3109_v53  ;;  %v3360_v41 = vsub.f32 %v3358_v23, %v3359_v45 }
 0x742   :  { %3254 = vmatpush.msrb.mxu1 %v5512_v30  ;;  %3286 = vmatpush.msrb.mxu2 %v5667_v1  ;;  %v3347_v30 = vand.u32 4294901760, %v5709_v37  ;;  %v3342_v10 = vsub.f32 %v5695_v51, %v3341_v54 }
 0x743   :  { %3320 = vmatpush.msrb.mxu3 %v3319_v56  ;;  %3377 = vmatpush.msra.mxu0 %v5633_v52 }
 0x744   :  { %3256 = vmatpush.msrb.mxu1 %v5521_v27  ;;  %3288 = vmatpush.msrb.mxu2 %v5681_v34  ;;  %v3337_v27 = vand.u32 4294901760, %v3336_v28  ;;  %v3348_v42 = vsub.f32 %v5709_v37, %v3347_v30 }
 0x745   :  { %3326 = vmatpush.msrb.mxu3 %v3325_v13  ;;  %3380 = vmatpush.msra.mxu0 %v5644_v47 }
 0x746   :  { %3258 = vmatpush.msrb.mxu1 %v5536_v0  ;;  %3290 = vmatpush.msrb.mxu2 %v5692_v57  ;;  %v3343_v0 = vand.u32 4294901760, %v3342_v10 }
 0x747   :  { %3332 = vmatpush.msrb.mxu3 %v3331_v32  ;;  %3383 = vmatpush.msra.mxu0 %v5654_v25 }
 0x748   :  { %3234 = vmatmul.f32.vlgmr.msrb.gmra.mxu0 %v4949_v16  ;;  %3260 = vmatpush.msrb.mxu1 %v5551_v60  ;;  %v3349_v60 = vand.u32 4294901760, %v3348_v42 }
 0x749   :  { %3292 = vmatpush.msrb.mxu2 %v5706_v61  ;;  %3338 = vmatpush.msrb.mxu3 %v3337_v27 }
 0x74a   :  { %3298 = vmatmul.f32.vlgmr.msrb.gmra.mxu2 %v5057_v31  ;;  %3386 = vmatpush.msra.mxu0 %v5663_v44  ;;  %v3355_v31 = vand.u32 4294901760, %v3354_v19 }
 0x74b   :  { %3450 = vmatpush.msra.mxu2 %v3311_v62  ;;  %3262 = vmatpush.msrb.mxu1 %v5572_v26  ;;  %v3361_v26 = vand.u32 4294901760, %v3360_v41 }
 0x74c   :  { %3344 = vmatpush.msrb.mxu3 %v3343_v0  ;;  %3264 = vmatmul.f32.vlgmr.msrb.gmra.mxu1 %v4949_v16 }
 0x74d   :  { %3389 = vmatpush.msra.mxu0 %v5677_v40  ;;  %3416 = vmatpush.msra.mxu1 %v5617_v24 }
 0x74e   :  { %3454 = vmatpush.msra.mxu2 %v3317_v3  ;;  %3350 = vmatpush.msrb.mxu3 %v3349_v60 }
 0x74f   :  { %3392 = vmatpush.msra.mxu0 %v5695_v51  ;;  %3418 = vmatpush.msra.mxu1 %v5626_v8 }
 0x750   :  { %3458 = vmatpush.msra.mxu2 %v3323_v17  ;;  %3356 = vmatpush.msrb.mxu3 %v3355_v31  ;;  %v3615_v31 = vld [vmem:[%s5819_s0] sm:$0xff] }
 0x751   :  { %3395 = vmatpush.msra.mxu0 %v5709_v37  ;;  %3420 = vmatpush.msra.mxu1 %v5635_v2 }
 0x752   :  { %3462 = vmatpush.msra.mxu2 %v3329_v48  ;;  %3362 = vmatpush.msrb.mxu3 %v3361_v26 }
 0x753   :  { %3364 = vmatmul.f32.vlgmr.msrb.gmra.mxu3 %v4949_v16  ;;  %3398 = vmatpush.msra.mxu0 %v5720_v49 }
 0x754   :  { %3422 = vmatpush.msra.mxu1 %v5641_v15  ;;  %3466 = vmatpush.msra.mxu2 %v3335_v46  ;;  %v2437_v59 = vpop.f32.mrf.mxu1 }
 0x755   :  { %3496 = vmatpush.msra.mxu3 %v5617_v24  ;;  %3401 = vmatpush.msra.mxu0 %v3358_v23 }
 0x756   :  { %3424 = vmatpush.msra.mxu1 %v5650_v33  ;;  %3470 = vmatpush.msra.mxu2 %v3341_v54 }
 0x757   :  { %3498 = vmatpush.msra.mxu3 %v5626_v8  ;;  %3404 = vmatmul.f32.vlgmr.msra.gmra.mxu0 %v4975_v58  ;;  %v2405_v21 = vpop.f32.mrf.mxu0 }
 0x758   :  { %3426 = vmatpush.msra.mxu1 %v5667_v1  ;;  %3474 = vmatpush.msra.mxu2 %v3347_v30  ;;  %v2299_v58 = vpop.f32.mrf.mxu2 }
 0x759   :  { %3500 = vmatpush.msra.mxu3 %v5635_v2  ;;  %v2300_v22 = vadd.f32 %v2299_v58, %v2263_v18 }
 0x75a   :  { %3428 = vmatpush.msra.mxu1 %v5681_v34  ;;  %3478 = vmatpush.msra.mxu2 %v3353_v43 }
 0x75b   :  { %3502 = vmatpush.msra.mxu3 %v5641_v15 }
 0x75c   :  { %3430 = vmatpush.msra.mxu1 %v5692_v57  ;;  %3482 = vmatpush.msra.mxu2 %v3359_v45 }
 0x75d   :  { %3504 = vmatpush.msra.mxu3 %v5650_v33  ;;  %3484 = vmatmul.f32.vlgmr.msra.gmra.mxu2 %v4949_v16 }
 0x75e   :  { %3432 = vmatpush.msra.mxu1 %v5706_v61 }
 0x75f   :  { %3506 = vmatpush.msra.mxu3 %v5667_v1  ;;  %3436 = vmatmul.f32.vlgmr.msra.gmra.mxu1 %v5006_v12 }
 0x761   :  { %3508 = vmatpush.msra.mxu3 %v5681_v34  ;;  %v2365_v53 = vpop.f32.mrf.mxu3 }
 0x762   :  { %v2366_v14 = vadd.f32 %v2365_v53, %v2300_v22  ;;  %v3616_v53 = vld [vmem:[%s5819_s0 + $0x8] sm:$0xff] }
 0x763   :  { %3510 = vmatpush.msra.mxu3 %v5692_v57 }
 0x764   :  { %v2406_v24 = vadd.f32 %v2405_v21, %v2366_v14 }
 0x765   :  { %3512 = vmatpush.msra.mxu3 %v5706_v61 }
 0x766   :  { %3514 = vmatmul.f32.vlgmr.msra.gmra.mxu3 %v4949_v16  ;;  %v2438_v6 = vadd.f32 %v2437_v59, %v2406_v24  ;;  %v3617_v24 = vld [vmem:[%s5819_s0 + $0x10] sm:$0xff] }
 0x76b   :  { %v2485_v39 = vpop.f32.mrf.mxu2 }
 0x76c   :  { %v2486_v8 = vadd.f32 %v2485_v39, %v2438_v6 }
 0x770   :  { %v2549_v9 = vpop.f32.mrf.mxu0 }
 0x771   :  { %v2550_v2 = vadd.f32 %v2549_v9, %v2263_v18 }
 0x773   :  { %v2515_v12 = vpop.f32.mrf.mxu3 }
 0x774   :  { %v2516_v38 = vadd.f32 %v2515_v12, %v2486_v8  ;;  %v3618_v8 = vld [vmem:[%s5819_s0 + $0x18] sm:$0xff] }
 0x776   :  { %3523 = vrot.lane.b32.xlu1 %v2516_v38, %s3701_s28 }
 0x779   :  { %v2615_v52 = vpop.f32.mrf.mxu1 }
 0x77a   :  { %v2616_v20 = vadd.f32 %v2615_v52, %v2550_v2  ;;  %v3619_v52 = vld [vmem:[%s5819_s0 + $0x20] sm:$0xff] }
 0x77d   :  { %v2655_v36 = vpop.f32.mrf.mxu2 }
 0x77e   :  { %v2656_v15 = vadd.f32 %v2655_v36, %v2616_v20 }
 0x786   :  { %v2687_v16 = vpop.f32.mrf.mxu3 }
 0x787   :  { %v2688_v47 = vadd.f32 %v2687_v16, %v2656_v15 }
 0x789   :  { %v2735_v33 = vpop.f32.mrf.mxu0 }
 0x78a   :  { %v2736_v62 = vadd.f32 %v2735_v33, %v2688_v47 }
 0x78d   :  { %v2765_v7 = vpop.f32.mrf.mxu1 }
 0x78e   :  { %v2766_v25 = vadd.f32 %v2765_v7, %v2736_v62 }
 0x790   :  { %3525 = vrot.lane.b32.xlu0 %v2766_v25, %s3701_s28 }
 0x791   :  { %v2799_v3 = vpop.f32.mrf.mxu2 }
 0x792   :  { %v2800_v44 = vadd.f32 %v2799_v3, %v2263_v18 }
 0x79a   :  { %v2865_v29 = vpop.f32.mrf.mxu3 }
 0x79b   :  { %v2866_v1 = vadd.f32 %v2865_v29, %v2800_v44 }
 0x79d   :  { %v2905_v50 = vpop.f32.mrf.mxu0 }
 0x79e   :  { %v2906_v17 = vadd.f32 %v2905_v50, %v2866_v1 }
 0x7a1   :  { %v2937_v4 = vpop.f32.mrf.mxu1 }
 0x7a2   :  { %v2938_v34 = vadd.f32 %v2937_v4, %v2906_v17 }
 0x7a5   :  { %v2985_v40 = vpop.f32.mrf.mxu2 }
 0x7a6   :  { %v2986_v5 = vadd.f32 %v2985_v40, %v2938_v34 }
 0x7ac   :  { %v3049_v57 = vpop.f32.mrf.mxu0 }
 0x7ad   :  { %v3050_v35 = vadd.f32 %v3049_v57, %v2263_v18 }
 0x7ae   :  { %v3015_v48 = vpop.f32.mrf.mxu3 }
 0x7af   :  { %v3016_v55 = vadd.f32 %v3015_v48, %v2986_v5 }
 0x7b1   :  { %3527 = vrot.lane.b32.xlu2 %v3016_v55, %s3701_s28 }
 0x7b5   :  { %v3115_v51 = vpop.f32.mrf.mxu1 }
 0x7b6   :  { %v3116_v46 = vadd.f32 %v3115_v51, %v3050_v35 }
 0x7b9   :  { %v3155_v63 = vpop.f32.mrf.mxu2 }
 0x7ba   :  { %v3156_v61 = vadd.f32 %v3155_v63, %v3116_v46 }
 0x7c2   :  { %v3187_v37 = vpop.f32.mrf.mxu3 }
 0x7c3   :  { %v3188_v56 = vadd.f32 %v3187_v37, %v3156_v61 }
 0x7c5   :  { %v3235_v11 = vpop.f32.mrf.mxu0 }
 0x7c6   :  { %v3236_v54 = vadd.f32 %v3235_v11, %v3188_v56 }
 0x7c9   :  { %v3265_v49 = vpop.f32.mrf.mxu1 }
 0x7ca   :  { %v3266_v13 = vadd.f32 %v3265_v49, %v3236_v54 }
 0x7cc   :  { %3529 = vrot.lane.b32.xlu1 %v3266_v13, %s3701_s28 }
 0x7cd   :  { %v3299_v28 = vpop.f32.mrf.mxu2 }
 0x7ce   :  { %v3300_v23 = vadd.f32 %v3299_v28, %v2263_v18 }
 0x7d4   :  { %v3405_v10 = vpop.f32.mrf.mxu0 }
 0x7d6   :  { %v3365_v30 = vpop.f32.mrf.mxu3 }
 0x7d7   :  { %v3366_v32 = vadd.f32 %v3365_v30, %v3300_v23 }
 0x7d9   :  { %v3406_v43 = vadd.f32 %v3405_v10, %v3366_v32 }
 0x7dc   :  { %v3437_v27 = vpop.f32.mrf.mxu1 }
 0x7dd   :  { %v3438_v45 = vadd.f32 %v3437_v27, %v3406_v43 }
 0x7e0   :  { %v3485_v42 = vpop.f32.mrf.mxu2 }
 0x7e1   :  { %v3486_v0 = vadd.f32 %v3485_v42, %v3438_v45 }
 0x7e8   :  { %v3524_v60 = vpop.permute.xlu1 %3523 }
 0x7e9   :  { %v3515_v19 = vpop.f32.mrf.mxu3  ;;  %v3542_v26 = vadd.f32 %v3615_v31, %v3524_v60 }
 0x7ea   :  { %v3516_v41 = vadd.f32 %v3515_v19, %v3486_v0 }
 0x7eb   :  { %3552 = vrot.lane.b32.xlu2 %v3542_v26, %s3700_s22 }
 0x7ec   :  { %3531 = vrot.lane.b32.xlu0 %v3516_v41, %s3701_s28 }
 0x802   :  { %v3526_v58 = vpop.permute.xlu0 %3525 }
 0x803   :  { %v3533_v18 = vsel %vm62_vm2, %v3524_v60, %v3526_v58 }
 0x804   :  { %v3543_v22 = vadd.f32 %v3616_v53, %v3533_v18 }
 0x806   :  { %3554 = vrot.lane.b32.xlu1 %v3543_v22, %s3700_s22 }
 0x80b   :  { %v3528_v14 = vpop.permute.xlu2 %3527 }
 0x80c   :  { %v3534_v21 = vsel %vm62_vm2, %v3526_v58, %v3528_v14 }
 0x80d   :  { %v3544_v59 = vadd.f32 %v3617_v24, %v3534_v21 }
 0x80f   :  { %3556 = vrot.lane.b32.xlu0 %v3544_v59, %s3700_s22 }
 0x83e   :  { %v3530_v39 = vpop.permute.xlu1 %3529 }
 0x83f   :  { %v3535_v6 = vsel %vm62_vm2, %v3528_v14, %v3530_v39 }
 0x840   :  { %v3545_v12 = vadd.f32 %v3618_v8, %v3535_v6 }
 0x842   :  { %3558 = vrot.lane.b32.xlu2 %v3545_v12, %s3700_s22 }
 0x845   :  { %v3553_v36 = vpop.permute.xlu2 %3552 }
 0x85e   :  { %v3532_v38 = vpop.permute.xlu0 %3531 }
 0x85f   :  { %v3536_v9 = vsel %vm62_vm2, %v3530_v39, %v3532_v38 }
 0x860   :  { %v3546_v2 = vadd.f32 %v3619_v52, %v3536_v9 }
 0x862   :  { %3560 = vrot.lane.b32.xlu1 %v3546_v2, %s3700_s22 }
 0x878   :  { %v3555_v20 = vpop.permute.xlu1 %3554 }
 0x879   :  { %v3562_v15 = vsel %vm86_vm0, %v3553_v36, %v3555_v20 }
 0x87a   :  { %3571 = vst [vmem:[#allocation9] sm:$0xff] %v3562_v15 }
 0x881   :  { %v3557_v16 = vpop.permute.xlu0 %3556 }
 0x882   :  { %v3563_v47 = vsel %vm86_vm0, %v3555_v20, %v3557_v16 }
 0x883   :  { %3572 = vst [vmem:[#allocation9 + $0x8] sm:$0xff] %v3563_v47 }
 0x89c   :  { %v3559_v33 = vpop.permute.xlu2 %3558 }
 0x89d   :  { %v3564_v62 = vsel %vm86_vm0, %v3557_v16, %v3559_v33 }
 0x89e   :  { %3573 = vst [vmem:[#allocation9 + $0x10] sm:$0xff] %v3564_v62 }
 0x8d4   :  { %v3561_v7 = vpop.permute.xlu1 %3560 }
 0x8d5   :  { %v3565_v25 = vsel %vm86_vm0, %v3559_v33, %v3561_v7  ;;  %3575 = vst.msk [vmem:[#allocation9 + $0x20] sm:$0xff] %vm99_vm1, %v3561_v7 }
 0x8d6   :  { %3574 = vst [vmem:[#allocation9 + $0x18] sm:$0xff] %v3565_v25 }
 0x8d7   :  { %3586 = dma.vmem_to_hbm [thread:$0]  %s3582_s10, 640, %s3584_s2, [#allocation6]  }
 0x8d8   :  { %3696 = dma.done.wait [#allocation6], 640  }
 0x8d9   :  { %3697 = vsyncadd [#allocation6], 4294966656 }
 0x8da   :  { %3591 = vsyncpa [#allocation5], 1 }
 0x8db   :  { %3592 = vsyncpa [#allocation8], 1 }
 0x8dc   :  { %3593 = vsyncpa [#allocation6], 1 }

</bundles_post_ra>
